<compile_context>
chip_gen: v7x
topology: tpu7x:2x2x1
jax: 0.10.0
libtpu: 0.0.40
codegen_flags: <defaults>
</compile_context>

<pallas_src>
import jax
import jax.numpy as jnp
from jax.experimental import pallas as pl
from jax.experimental.pallas import tpu as pltpu


# ----------------------------- Pallas kernel ---------------------------------

def _sigmoid(x):
    # exp on the EUP; approximate reciprocal also on the EUP slot (no VALU divide)
    return pl.reciprocal(1.0 + jnp.exp(-x), approx=True)


def _lstm_cell(gates, c_prev, hidden):
    """gates: (B, 4H) f32 pre-activations, PyTorch gate order i, f, g, o."""
    i_f = _sigmoid(gates[:, :2 * hidden])          # fused sigmoid over i|f
    i_g = i_f[:, :hidden]
    f_g = i_f[:, hidden:]
    g_g = jnp.tanh(gates[:, 2 * hidden:3 * hidden])
    o_g = _sigmoid(gates[:, 3 * hidden:])
    c_new = f_g * c_prev + i_g * g_g
    h_new = o_g * jnp.tanh(c_new)
    return h_new, c_new


def _decoder_kernel(cap_ref,                        # SMEM (B, Tc) int32 (scalar prefetch)
                    feat_ref,                       # (B, E)  f32
                    emb_ref,                        # (V, E)  bf16
                    wih0_ref, whh0_ref, b0_ref,     # (E,4H) (H,4H) bf16, (1,4H) f32
                    wih1_ref, whh1_ref, b1_ref,     # (H,4H) (H,4H) bf16, (1,4H) f32
                    wout_ref, bout_ref,             # (H,V)  bf16, (1,V)  f32
                    out_ref,                        # (B, V) f32 block of (B, Tc*V)
                    tproj_sc,                       # (V, 4H) bf16 scratch
                    xp_sc,                          # (B, 4H) f32 scratch
                    h0_sc, c0_sc, h1_sc, c1_sc):    # (B, H) f32 scratch
    t = pl.program_id(0)
    b_sz, hidden = h0_sc.shape
    vocab = emb_ref.shape[0]

    @pl.when(t == 0)
    def _():
        h0_sc[...] = jnp.zeros_like(h0_sc)
        c0_sc[...] = jnp.zeros_like(c0_sc)
        h1_sc[...] = jnp.zeros_like(h1_sc)
        c1_sc[...] = jnp.zeros_like(c1_sc)
        # Pre-multiplied table: one-hot(token) @ tproj == embed(token)@W_ih0 + b0.
        tproj_sc[...] = (jnp.dot(emb_ref[...], wih0_ref[...],
                                 preferred_element_type=jnp.float32)
                         + b0_ref[...]).astype(tproj_sc.dtype)
        # t == 0 input row is the image feature vector.
        xp_sc[...] = jnp.dot(feat_ref[...].astype(jnp.bfloat16), wih0_ref[...],
                             preferred_element_type=jnp.float32) + b0_ref[...]

    @pl.when(t > 0)
    def _():
        # Build one-hot(captions[:, t-1]) from SMEM scalars; apply it on the MXU.
        row = jax.lax.broadcasted_iota(jnp.int32, (b_sz, vocab), 0)
        lane = jax.lax.broadcasted_iota(jnp.int32, (b_sz, vocab), 1)
        tok = jnp.zeros((b_sz, vocab), jnp.int32)
        for b in range(b_sz):                       # static B, SMEM scalar reads
            tok = jnp.where(row == b, cap_ref[b, t - 1], tok)
        onehot = jnp.where(lane == tok, 1.0, 0.0).astype(jnp.bfloat16)
        xp_sc[...] = jnp.dot(onehot, tproj_sc[...],
                             preferred_element_type=jnp.float32)

    # -------- layer 0 recurrence --------
    gates0 = xp_sc[...] + jnp.dot(h0_sc[...].astype(jnp.bfloat16), whh0_ref[...],
                                  preferred_element_type=jnp.float32)
    h0_new, c0_new = _lstm_cell(gates0, c0_sc[...], hidden)
    h0_sc[...] = h0_new
    c0_sc[...] = c0_new

    # -------- layer 1 (input projection fused into the step) --------
    gates1 = (jnp.dot(h0_new.astype(jnp.bfloat16), wih1_ref[...],
                      preferred_element_type=jnp.float32)
              + jnp.dot(h1_sc[...].astype(jnp.bfloat16), whh1_ref[...],
                        preferred_element_type=jnp.float32)
              + b1_ref[...])
    h1_new, c1_new = _lstm_cell(gates1, c1_sc[...], hidden)
    h1_sc[...] = h1_new
    c1_sc[...] = c1_new

    # -------- vocab head, written straight into the (B, Tc, V) layout --------
    out_ref[...] = (jnp.dot(h1_new.astype(jnp.bfloat16), wout_ref[...],
                            preferred_element_type=jnp.float32)
                    + bout_ref[...])


# ----------------------------- wrapper ----------------------------------------

@jax.jit
def decoder_forward(params, features, captions):
    """features:(B, E) f32, captions:(B, Tc) int32 -> logits (B, Tc, V) f32."""
    b, tc = captions.shape
    v, e = params["embedding"].shape
    h = params["w_hh0"].shape[0]
    g = 4 * h

    flat = pl.pallas_call(
        _decoder_kernel,
        grid_spec=pltpu.PrefetchScalarGridSpec(
            num_scalar_prefetch=1,                       # captions -> SMEM
            grid=(tc,),
            in_specs=[
                pl.BlockSpec((b, e), lambda t, cap: (0, 0)),   # features
                pl.BlockSpec((v, e), lambda t, cap: (0, 0)),   # embedding table
                pl.BlockSpec((e, g), lambda t, cap: (0, 0)),   # w_ih0
                pl.BlockSpec((h, g), lambda t, cap: (0, 0)),   # w_hh0
                pl.BlockSpec((1, g), lambda t, cap: (0, 0)),   # b0 (= b_ih0+b_hh0)
                pl.BlockSpec((h, g), lambda t, cap: (0, 0)),   # w_ih1
                pl.BlockSpec((h, g), lambda t, cap: (0, 0)),   # w_hh1
                pl.BlockSpec((1, g), lambda t, cap: (0, 0)),   # b1
                pl.BlockSpec((h, v), lambda t, cap: (0, 0)),   # w_out
                pl.BlockSpec((1, v), lambda t, cap: (0, 0)),   # b_out
            ],
            out_specs=pl.BlockSpec((b, v), lambda t, cap: (0, t)),
            scratch_shapes=[
                pltpu.VMEM((v, g), jnp.bfloat16),   # pre-multiplied embed table
                pltpu.VMEM((b, g), jnp.float32),    # per-step input projection
                pltpu.VMEM((b, h), jnp.float32),    # h0
                pltpu.VMEM((b, h), jnp.float32),    # c0
                pltpu.VMEM((b, h), jnp.float32),    # h1
                pltpu.VMEM((b, h), jnp.float32),    # c1
            ],
        ),
        out_shape=jax.ShapeDtypeStruct((b, tc * v), jnp.float32),
        compiler_params=pltpu.CompilerParams(
            dimension_semantics=("arbitrary",)),           # sequential recurrence
    )(captions.astype(jnp.int32), features,
      params["embedding"], params["w_ih0"], params["w_hh0"], params["b0"],
      params["w_ih1"], params["w_hh1"], params["b1"],
      params["w_out"], params["b_out"])

    return flat.reshape(b, tc, v)                          # bitcast, no copy


# ----------------------------- parameters -------------------------------------

def init_params(key, embed_size, hidden_size, vocab_size):
    e, h, v = embed_size, hidden_size, vocab_size
    ks = iter(jax.random.split(key, 12))

    def u(k, shape, bound):
        return jax.random.uniform(k, shape, jnp.float32, -bound, bound)

    xb_emb = (6.0 / (v + e)) ** 0.5          # xavier_uniform_(embedding.weight)
    xb_lin = (6.0 / (h + v)) ** 0.5          # xavier_uniform_(linear.weight)
    lb = 1.0 / (h ** 0.5)                    # PyTorch LSTM / Linear-bias default
    wd = jnp.bfloat16                        # MXU operand dtype (f32 accumulate)

    return {
        # LSTM / Linear weights stored pre-transposed (in, out); gate order i,f,g,o.
        "embedding": u(next(ks), (v, e), xb_emb).astype(wd),
        "w_ih0": u(next(ks), (e, 4 * h), lb).astype(wd),
        "w_hh0": u(next(ks), (h, 4 * h), lb).astype(wd),
        "b0": u(next(ks), (1, 4 * h), lb) + u(next(ks), (1, 4 * h), lb),  # b_ih+b_hh
        "w_ih1": u(next(ks), (h, 4 * h), lb).astype(wd),
        "w_hh1": u(next(ks), (h, 4 * h), lb).astype(wd),
        "b1": u(next(ks), (1, 4 * h), lb) + u(next(ks), (1, 4 * h), lb),
        "w_out": u(next(ks), (h, v), xb_lin).astype(wd),
        "b_out": u(next(ks), (1, v), lb),
    }


# ----------------------------- pure-JAX reference ------------------------------

def _sigmoid_ref(x):
    return 1.0 / (1.0 + jnp.exp(-x))


def _lstm_ref(x_seq, w_ih, w_hh, bias):
    b, t, _ = x_seq.shape
    hd = w_hh.shape[0]
    h = jnp.zeros((b, hd), jnp.float32)
    c = jnp.zeros((b, hd), jnp.float32)
    outs = []
    for step in range(t):
        gates = x_seq[:, step] @ w_ih + h @ w_hh + bias
        i_g = _sigmoid_ref(gates[:, :hd])
        f_g = _sigmoid_ref(gates[:, hd:2 * hd])
        g_g = jnp.tanh(gates[:, 2 * hd:3 * hd])
        o_g = _sigmoid_ref(gates[:, 3 * hd:])
        c = f_g * c + i_g * g_g
        h = o_g * jnp.tanh(c)
        outs.append(h)
    return jnp.stack(outs, axis=1)


@jax.jit
def decoder_forward_ref(params, features, captions):
    f32 = lambda x: x.astype(jnp.float32)
    embeds = f32(params["embedding"])[captions[:, :-1]]
    inputs = jnp.concatenate([features[:, None, :], embeds], axis=1)
    h0 = _lstm_ref(inputs, f32(params["w_ih0"]), f32(params["w_hh0"]), params["b0"])
    h1 = _lstm_ref(h0, f32(params["w_ih1"]), f32(params["w_hh1"]), params["b1"])
    return h1 @ f32(params["w_out"]) + params["b_out"]


# ----------------------------- main -------------------------------------------

if __name__ == "__main__":
    embed_size, hidden_size, vocab_size = 128, 128, 256   # lane-dense sizes
    batch, cap_len = 8, 10

    key = jax.random.PRNGKey(0)
    kp, kf, kc = jax.random.split(key, 3)
    params = init_params(kp, embed_size, hidden_size, vocab_size)
    features = jax.random.normal(kf, (batch, embed_size), jnp.float32)
    captions = jax.random.randint(kc, (batch, cap_len), 0, vocab_size,
                                  dtype=jnp.int32)

    logits = jax.block_until_ready(decoder_forward(params, features, captions))
    assert logits.shape == (batch, cap_len, vocab_size), logits.shape
    assert bool(jnp.all(jnp.isfinite(logits)))

    ref = decoder_forward_ref(params, features, captions)
    err = float(jnp.max(jnp.abs(logits - ref)))
    # bf16 MXU operands + approx-reciprocal sigmoid give a small, bounded drift.
    assert err < 2e-2, f"max abs err vs pure-JAX reference: {err}"

    print("KERNEL_OK")
</pallas_src>

<mosaic_0001>
module attributes {stable_mosaic.version = 11 : i64} {
  func.func @_decoder_kernel(%arg0: i32, %arg1: memref<8x10xi32, #tpu.memory_space<smem>>, %arg2: memref<8x128xf32, #tpu.memory_space<vmem>>, %arg3: memref<256x128xbf16, #tpu.memory_space<vmem>>, %arg4: memref<128x512xbf16, #tpu.memory_space<vmem>>, %arg5: memref<128x512xbf16, #tpu.memory_space<vmem>>, %arg6: memref<1x512xf32, #tpu.memory_space<vmem>>, %arg7: memref<128x512xbf16, #tpu.memory_space<vmem>>, %arg8: memref<128x512xbf16, #tpu.memory_space<vmem>>, %arg9: memref<1x512xf32, #tpu.memory_space<vmem>>, %arg10: memref<128x256xbf16, #tpu.memory_space<vmem>>, %arg11: memref<1x256xf32, #tpu.memory_space<vmem>>, %arg12: memref<8x256xf32, #tpu.memory_space<vmem>>, %arg13: memref<256x512xbf16, #tpu.memory_space<vmem>>, %arg14: memref<8x512xf32, #tpu.memory_space<vmem>>, %arg15: memref<8x128xf32, #tpu.memory_space<vmem>>, %arg16: memref<8x128xf32, #tpu.memory_space<vmem>>, %arg17: memref<8x128xf32, #tpu.memory_space<vmem>>, %arg18: memref<8x128xf32, #tpu.memory_space<vmem>>) attributes {dimension_semantics = [#tpu.dimension_semantics<arbitrary>], iteration_bounds = array<i64: 10>, scalar_prefetch = 1 : i64, scratch_operands = 6 : i64, tpu.core_type = #tpu.core_type<tc>, window_params = [{pipeline_mode = #tpu.pipeline_mode<synchronous>, transform_indices = @transform_0, window_bounds = array<i64: 8, 128>}, {pipeline_mode = #tpu.pipeline_mode<synchronous>, transform_indices = @transform_1, window_bounds = array<i64: 256, 128>}, {pipeline_mode = #tpu.pipeline_mode<synchronous>, transform_indices = @transform_2, window_bounds = array<i64: 128, 512>}, {pipeline_mode = #tpu.pipeline_mode<synchronous>, transform_indices = @transform_3, window_bounds = array<i64: 128, 512>}, {pipeline_mode = #tpu.pipeline_mode<synchronous>, transform_indices = @transform_4, window_bounds = array<i64: 1, 512>}, {pipeline_mode = #tpu.pipeline_mode<synchronous>, transform_indices = @transform_5, window_bounds = array<i64: 128, 512>}, {pipeline_mode = #tpu.pipeline_mode<synchronous>, transform_indices = @transform_6, window_bounds = array<i64: 128, 512>}, {pipeline_mode = #tpu.pipeline_mode<synchronous>, transform_indices = @transform_7, window_bounds = array<i64: 1, 512>}, {pipeline_mode = #tpu.pipeline_mode<synchronous>, transform_indices = @transform_8, window_bounds = array<i64: 128, 256>}, {pipeline_mode = #tpu.pipeline_mode<synchronous>, transform_indices = @transform_9, window_bounds = array<i64: 1, 256>}, {transform_indices = @transform_10, window_bounds = array<i64: 8, 256>}]} {
    %c0_i32 = arith.constant 0 : i32
    %0 = arith.cmpi eq, %arg0, %c0_i32 : i32
    %1 = arith.extui %0 : i1 to i32
    %c0_i32_0 = arith.constant 0 : i32
    %2 = arith.cmpi ne, %1, %c0_i32_0 : i32
    scf.if %2 {
      %cst_45 = arith.constant 0.000000e+00 : f32
      %82 = vector.broadcast %cst_45 : f32 to vector<8x128xf32>
      %c0_46 = arith.constant 0 : index
      %c0_47 = arith.constant 0 : index
      %83 = vector.load %arg15[%c0_46, %c0_47] : memref<8x128xf32, #tpu.memory_space<vmem>>, vector<8x128xf32>
      tpu.vector_store %arg15[%c0_46, %c0_47], %82 {strides = array<i32>} : memref<8x128xf32, #tpu.memory_space<vmem>>, vector<8x128xf32>,
      %cst_48 = arith.constant 0.000000e+00 : f32
      %84 = vector.broadcast %cst_48 : f32 to vector<8x128xf32>
      %c0_49 = arith.constant 0 : index
      %c0_50 = arith.constant 0 : index
      %85 = vector.load %arg16[%c0_49, %c0_50] : memref<8x128xf32, #tpu.memory_space<vmem>>, vector<8x128xf32>
      tpu.vector_store %arg16[%c0_49, %c0_50], %84 {strides = array<i32>} : memref<8x128xf32, #tpu.memory_space<vmem>>, vector<8x128xf32>,
      %cst_51 = arith.constant 0.000000e+00 : f32
      %86 = vector.broadcast %cst_51 : f32 to vector<8x128xf32>
      %c0_52 = arith.constant 0 : index
      %c0_53 = arith.constant 0 : index
      %87 = vector.load %arg17[%c0_52, %c0_53] : memref<8x128xf32, #tpu.memory_space<vmem>>, vector<8x128xf32>
      tpu.vector_store %arg17[%c0_52, %c0_53], %86 {strides = array<i32>} : memref<8x128xf32, #tpu.memory_space<vmem>>, vector<8x128xf32>,
      %cst_54 = arith.constant 0.000000e+00 : f32
      %88 = vector.broadcast %cst_54 : f32 to vector<8x128xf32>
      %c0_55 = arith.constant 0 : index
      %c0_56 = arith.constant 0 : index
      %89 = vector.load %arg18[%c0_55, %c0_56] : memref<8x128xf32, #tpu.memory_space<vmem>>, vector<8x128xf32>
      tpu.vector_store %arg18[%c0_55, %c0_56], %88 {strides = array<i32>} : memref<8x128xf32, #tpu.memory_space<vmem>>, vector<8x128xf32>,
      %c0_57 = arith.constant 0 : index
      %c0_58 = arith.constant 0 : index
      %90 = vector.load %arg3[%c0_57, %c0_58] : memref<256x128xbf16, #tpu.memory_space<vmem>>, vector<256x128xbf16>
      %c0_59 = arith.constant 0 : index
      %c0_60 = arith.constant 0 : index
      %91 = vector.load %arg4[%c0_59, %c0_60] : memref<128x512xbf16, #tpu.memory_space<vmem>>, vector<128x512xbf16>
      %cst_61 = arith.constant dense<0.000000e+00> : vector<256x512xf32>
      %92 = tpu.matmul %90, %91, %cst_61 {dimension_numbers = #tpu.dot_dimension_numbers<[1], [0], [0], [1], [0, 0, 1, 1], [], []>} : vector<256x128xbf16>, vector<128x512xbf16>, vector<256x512xf32> -> vector<256x512xf32>
      %c0_62 = arith.constant 0 : index
      %c0_63 = arith.constant 0 : index
      %93 = vector.load %arg6[%c0_62, %c0_63] : memref<1x512xf32, #tpu.memory_space<vmem>>, vector<1x512xf32>
      %94 = vector.broadcast %93 : vector<1x512xf32> to vector<256x512xf32>
      %95 = arith.addf %92, %94 : vector<256x512xf32>
      %96 = arith.truncf %95 : vector<256x512xf32> to vector<256x512xbf16>
      %c0_64 = arith.constant 0 : index
      %c0_65 = arith.constant 0 : index
      %97 = vector.load %arg13[%c0_64, %c0_65] : memref<256x512xbf16, #tpu.memory_space<vmem>>, vector<256x512xbf16>
      tpu.vector_store %arg13[%c0_64, %c0_65], %96 {strides = array<i32>} : memref<256x512xbf16, #tpu.memory_space<vmem>>, vector<256x512xbf16>,
      %c0_66 = arith.constant 0 : index
      %c0_67 = arith.constant 0 : index
      %98 = vector.load %arg2[%c0_66, %c0_67] : memref<8x128xf32, #tpu.memory_space<vmem>>, vector<8x128xf32>
      %99 = arith.truncf %98 : vector<8x128xf32> to vector<8x128xbf16>
      %c0_68 = arith.constant 0 : index
      %c0_69 = arith.constant 0 : index
      %100 = vector.load %arg4[%c0_68, %c0_69] : memref<128x512xbf16, #tpu.memory_space<vmem>>, vector<128x512xbf16>
      %cst_70 = arith.constant dense<0.000000e+00> : vector<8x512xf32>
      %101 = tpu.matmul %99, %100, %cst_70 {dimension_numbers = #tpu.dot_dimension_numbers<[1], [0], [0], [1], [0, 0, 1, 1], [], []>} : vector<8x128xbf16>, vector<128x512xbf16>, vector<8x512xf32> -> vector<8x512xf32>
      %c0_71 = arith.constant 0 : index
      %c0_72 = arith.constant 0 : index
      %102 = vector.load %arg6[%c0_71, %c0_72] : memref<1x512xf32, #tpu.memory_space<vmem>>, vector<1x512xf32>
      %103 = vector.broadcast %102 : vector<1x512xf32> to vector<8x512xf32>
      %104 = arith.addf %101, %103 : vector<8x512xf32>
      %c0_73 = arith.constant 0 : index
      %c0_74 = arith.constant 0 : index
      %105 = vector.load %arg14[%c0_73, %c0_74] : memref<8x512xf32, #tpu.memory_space<vmem>>, vector<8x512xf32>
      tpu.vector_store %arg14[%c0_73, %c0_74], %104 {strides = array<i32>} : memref<8x512xf32, #tpu.memory_space<vmem>>, vector<8x512xf32>,
    } else {
    }
    %c0_i32_1 = arith.constant 0 : i32
    %3 = arith.cmpi sgt, %arg0, %c0_i32_1 : i32
    %4 = arith.extui %3 : i1 to i32
    %c0_i32_2 = arith.constant 0 : i32
    %5 = arith.cmpi ne, %4, %c0_i32_2 : i32
    scf.if %5 {
      %82 = tpu.iota {dimensions = array<i32: 0>} : vector<8x256xi32>
      %83 = tpu.iota {dimensions = array<i32: 1>} : vector<8x256xi32>
      %c0_i32_45 = arith.constant 0 : i32
      %84 = vector.broadcast %c0_i32_45 : i32 to vector<8x256xi32>
      %c0_i32_46 = arith.constant 0 : i32
      %85 = vector.broadcast %c0_i32_46 : i32 to vector<8x256xi32>
      %86 = arith.cmpi eq, %82, %85 : vector<8x256xi32>
      %c1_i32 = arith.constant 1 : i32
      %87 = arith.subi %arg0, %c1_i32 : i32
      %c0_47 = arith.constant 0 : index
      %88 = arith.index_cast %87 : i32 to index
      %89 = memref.load %arg1[%c0_47, %88] : memref<8x10xi32, #tpu.memory_space<smem>>
      %90 = vector.broadcast %89 : i32 to vector<8x256xi32>
      %91 = arith.select %86, %90, %84 : vector<8x256xi1>, vector<8x256xi32>
      %c1_i32_48 = arith.constant 1 : i32
      %92 = vector.broadcast %c1_i32_48 : i32 to vector<8x256xi32>
      %93 = arith.cmpi eq, %82, %92 : vector<8x256xi32>
      %c1_i32_49 = arith.constant 1 : i32
      %94 = arith.subi %arg0, %c1_i32_49 : i32
      %c1 = arith.constant 1 : index
      %95 = arith.index_cast %94 : i32 to index
      %96 = memref.load %arg1[%c1, %95] : memref<8x10xi32, #tpu.memory_space<smem>>
      %97 = vector.broadcast %96 : i32 to vector<8x256xi32>
      %98 = arith.select %93, %97, %91 : vector<8x256xi1>, vector<8x256xi32>
      %c2_i32 = arith.constant 2 : i32
      %99 = vector.broadcast %c2_i32 : i32 to vector<8x256xi32>
      %100 = arith.cmpi eq, %82, %99 : vector<8x256xi32>
      %c1_i32_50 = arith.constant 1 : i32
      %101 = arith.subi %arg0, %c1_i32_50 : i32
      %c2 = arith.constant 2 : index
      %102 = arith.index_cast %101 : i32 to index
      %103 = memref.load %arg1[%c2, %102] : memref<8x10xi32, #tpu.memory_space<smem>>
      %104 = vector.broadcast %103 : i32 to vector<8x256xi32>
      %105 = arith.select %100, %104, %98 : vector<8x256xi1>, vector<8x256xi32>
      %c3_i32 = arith.constant 3 : i32
      %106 = vector.broadcast %c3_i32 : i32 to vector<8x256xi32>
      %107 = arith.cmpi eq, %82, %106 : vector<8x256xi32>
      %c1_i32_51 = arith.constant 1 : i32
      %108 = arith.subi %arg0, %c1_i32_51 : i32
      %c3 = arith.constant 3 : index
      %109 = arith.index_cast %108 : i32 to index
      %110 = memref.load %arg1[%c3, %109] : memref<8x10xi32, #tpu.memory_space<smem>>
      %111 = vector.broadcast %110 : i32 to vector<8x256xi32>
      %112 = arith.select %107, %111, %105 : vector<8x256xi1>, vector<8x256xi32>
      %c4_i32 = arith.constant 4 : i32
      %113 = vector.broadcast %c4_i32 : i32 to vector<8x256xi32>
      %114 = arith.cmpi eq, %82, %113 : vector<8x256xi32>
      %c1_i32_52 = arith.constant 1 : i32
      %115 = arith.subi %arg0, %c1_i32_52 : i32
      %c4 = arith.constant 4 : index
      %116 = arith.index_cast %115 : i32 to index
      %117 = memref.load %arg1[%c4, %116] : memref<8x10xi32, #tpu.memory_space<smem>>
      %118 = vector.broadcast %117 : i32 to vector<8x256xi32>
      %119 = arith.select %114, %118, %112 : vector<8x256xi1>, vector<8x256xi32>
      %c5_i32 = arith.constant 5 : i32
      %120 = vector.broadcast %c5_i32 : i32 to vector<8x256xi32>
      %121 = arith.cmpi eq, %82, %120 : vector<8x256xi32>
      %c1_i32_53 = arith.constant 1 : i32
      %122 = arith.subi %arg0, %c1_i32_53 : i32
      %c5 = arith.constant 5 : index
      %123 = arith.index_cast %122 : i32 to index
      %124 = memref.load %arg1[%c5, %123] : memref<8x10xi32, #tpu.memory_space<smem>>
      %125 = vector.broadcast %124 : i32 to vector<8x256xi32>
      %126 = arith.select %121, %125, %119 : vector<8x256xi1>, vector<8x256xi32>
      %c6_i32 = arith.constant 6 : i32
      %127 = vector.broadcast %c6_i32 : i32 to vector<8x256xi32>
      %128 = arith.cmpi eq, %82, %127 : vector<8x256xi32>
      %c1_i32_54 = arith.constant 1 : i32
      %129 = arith.subi %arg0, %c1_i32_54 : i32
      %c6 = arith.constant 6 : index
      %130 = arith.index_cast %129 : i32 to index
      %131 = memref.load %arg1[%c6, %130] : memref<8x10xi32, #tpu.memory_space<smem>>
      %132 = vector.broadcast %131 : i32 to vector<8x256xi32>
      %133 = arith.select %128, %132, %126 : vector<8x256xi1>, vector<8x256xi32>
      %c7_i32 = arith.constant 7 : i32
      %134 = vector.broadcast %c7_i32 : i32 to vector<8x256xi32>
      %135 = arith.cmpi eq, %82, %134 : vector<8x256xi32>
      %c1_i32_55 = arith.constant 1 : i32
      %136 = arith.subi %arg0, %c1_i32_55 : i32
      %c7 = arith.constant 7 : index
      %137 = arith.index_cast %136 : i32 to index
      %138 = memref.load %arg1[%c7, %137] : memref<8x10xi32, #tpu.memory_space<smem>>
      %139 = vector.broadcast %138 : i32 to vector<8x256xi32>
      %140 = arith.select %135, %139, %133 : vector<8x256xi1>, vector<8x256xi32>
      %141 = arith.cmpi eq, %83, %140 : vector<8x256xi32>
      %cst_56 = arith.constant 1.000000e+00 : f32
      %cst_57 = arith.constant 0.000000e+00 : f32
      %142 = vector.broadcast %cst_56 : f32 to vector<8x256xf32>
      %143 = vector.broadcast %cst_57 : f32 to vector<8x256xf32>
      %144 = arith.select %141, %142, %143 : vector<8x256xi1>, vector<8x256xf32>
      %145 = arith.truncf %144 : vector<8x256xf32> to vector<8x256xbf16>
      %c0_58 = arith.constant 0 : index
      %c0_59 = arith.constant 0 : index
      %146 = vector.load %arg13[%c0_58, %c0_59] : memref<256x512xbf16, #tpu.memory_space<vmem>>, vector<256x512xbf16>
      %cst_60 = arith.constant dense<0.000000e+00> : vector<8x512xf32>
      %147 = tpu.matmul %145, %146, %cst_60 {dimension_numbers = #tpu.dot_dimension_numbers<[1], [0], [0], [1], [0, 0, 1, 1], [], []>} : vector<8x256xbf16>, vector<256x512xbf16>, vector<8x512xf32> -> vector<8x512xf32>
      %c0_61 = arith.constant 0 : index
      %c0_62 = arith.constant 0 : index
      %148 = vector.load %arg14[%c0_61, %c0_62] : memref<8x512xf32, #tpu.memory_space<vmem>>, vector<8x512xf32>
      tpu.vector_store %arg14[%c0_61, %c0_62], %147 {strides = array<i32>} : memref<8x512xf32, #tpu.memory_space<vmem>>, vector<8x512xf32>,
    } else {
    }
    %c0 = arith.constant 0 : index
    %c0_3 = arith.constant 0 : index
    %6 = vector.load %arg14[%c0, %c0_3] : memref<8x512xf32, #tpu.memory_space<vmem>>, vector<8x512xf32>
    %c0_4 = arith.constant 0 : index
    %c0_5 = arith.constant 0 : index
    %7 = vector.load %arg15[%c0_4, %c0_5] : memref<8x128xf32, #tpu.memory_space<vmem>>, vector<8x128xf32>
    %8 = arith.truncf %7 : vector<8x128xf32> to vector<8x128xbf16>
    %c0_6 = arith.constant 0 : index
    %c0_7 = arith.constant 0 : index
    %9 = vector.load %arg5[%c0_6, %c0_7] : memref<128x512xbf16, #tpu.memory_space<vmem>>, vector<128x512xbf16>
    %cst = arith.constant dense<0.000000e+00> : vector<8x512xf32>
    %10 = tpu.matmul %8, %9, %cst {dimension_numbers = #tpu.dot_dimension_numbers<[1], [0], [0], [1], [0, 0, 1, 1], [], []>} : vector<8x128xbf16>, vector<128x512xbf16>, vector<8x512xf32> -> vector<8x512xf32>
    %11 = arith.addf %6, %10 : vector<8x512xf32>
    %c0_8 = arith.constant 0 : index
    %c0_9 = arith.constant 0 : index
    %12 = vector.load %arg16[%c0_8, %c0_9] : memref<8x128xf32, #tpu.memory_space<vmem>>, vector<8x128xf32>
    %13 = vector.extract_strided_slice %11 {offsets = [0, 0], sizes = [8, 256], strides = [1, 1]} : vector<8x512xf32> to vector<8x256xf32>
    %cst_10 = arith.constant 0.000000e+00 : f32
    %14 = vector.broadcast %cst_10 : f32 to vector<8x256xf32>
    %15 = arith.subf %14, %13 : vector<8x256xf32>
    %16 = math.exp %15 : vector<8x256xf32>
    %cst_11 = arith.constant 1.000000e+00 : f32
    %17 = vector.broadcast %cst_11 : f32 to vector<8x256xf32>
    %18 = arith.addf %17, %16 : vector<8x256xf32>
    %19 = tpu.reciprocal %18 {approx = true} : vector<8x256xf32> -> vector<8x256xf32>
    %20 = vector.extract_strided_slice %19 {offsets = [0, 0], sizes = [8, 128], strides = [1, 1]} : vector<8x256xf32> to vector<8x128xf32>
    %21 = vector.extract_strided_slice %19 {offsets = [0, 128], sizes = [8, 128], strides = [1, 1]} : vector<8x256xf32> to vector<8x128xf32>
    %22 = vector.extract_strided_slice %11 {offsets = [0, 256], sizes = [8, 128], strides = [1, 1]} : vector<8x512xf32> to vector<8x128xf32>
    %23 = math.tanh %22 : vector<8x128xf32>
    %24 = vector.extract_strided_slice %11 {offsets = [0, 384], sizes = [8, 128], strides = [1, 1]} : vector<8x512xf32> to vector<8x128xf32>
    %cst_12 = arith.constant 0.000000e+00 : f32
    %25 = vector.broadcast %cst_12 : f32 to vector<8x128xf32>
    %26 = arith.subf %25, %24 : vector<8x128xf32>
    %27 = math.exp %26 : vector<8x128xf32>
    %cst_13 = arith.constant 1.000000e+00 : f32
    %28 = vector.broadcast %cst_13 : f32 to vector<8x128xf32>
    %29 = arith.addf %28, %27 : vector<8x128xf32>
    %30 = tpu.reciprocal %29 {approx = true} : vector<8x128xf32> -> vector<8x128xf32>
    %31 = arith.mulf %21, %12 : vector<8x128xf32>
    %32 = arith.mulf %20, %23 : vector<8x128xf32>
    %33 = arith.addf %31, %32 : vector<8x128xf32>
    %34 = math.tanh %33 : vector<8x128xf32>
    %35 = arith.mulf %30, %34 : vector<8x128xf32>
    %c0_14 = arith.constant 0 : index
    %c0_15 = arith.constant 0 : index
    %36 = vector.load %arg15[%c0_14, %c0_15] : memref<8x128xf32, #tpu.memory_space<vmem>>, vector<8x128xf32>
    tpu.vector_store %arg15[%c0_14, %c0_15], %35 {strides = array<i32>} : memref<8x128xf32, #tpu.memory_space<vmem>>, vector<8x128xf32>,
    %c0_16 = arith.constant 0 : index
    %c0_17 = arith.constant 0 : index
    %37 = vector.load %arg16[%c0_16, %c0_17] : memref<8x128xf32, #tpu.memory_space<vmem>>, vector<8x128xf32>
    tpu.vector_store %arg16[%c0_16, %c0_17], %33 {strides = array<i32>} : memref<8x128xf32, #tpu.memory_space<vmem>>, vector<8x128xf32>,
    %38 = arith.truncf %35 : vector<8x128xf32> to vector<8x128xbf16>
    %c0_18 = arith.constant 0 : index
    %c0_19 = arith.constant 0 : index
    %39 = vector.load %arg7[%c0_18, %c0_19] : memref<128x512xbf16, #tpu.memory_space<vmem>>, vector<128x512xbf16>
    %cst_20 = arith.constant dense<0.000000e+00> : vector<8x512xf32>
    %40 = tpu.matmul %38, %39, %cst_20 {dimension_numbers = #tpu.dot_dimension_numbers<[1], [0], [0], [1], [0, 0, 1, 1], [], []>} : vector<8x128xbf16>, vector<128x512xbf16>, vector<8x512xf32> -> vector<8x512xf32>
    %c0_21 = arith.constant 0 : index
    %c0_22 = arith.constant 0 : index
    %41 = vector.load %arg17[%c0_21, %c0_22] : memref<8x128xf32, #tpu.memory_space<vmem>>, vector<8x128xf32>
    %42 = arith.truncf %41 : vector<8x128xf32> to vector<8x128xbf16>
    %c0_23 = arith.constant 0 : index
    %c0_24 = arith.constant 0 : index
    %43 = vector.load %arg8[%c0_23, %c0_24] : memref<128x512xbf16, #tpu.memory_space<vmem>>, vector<128x512xbf16>
    %cst_25 = arith.constant dense<0.000000e+00> : vector<8x512xf32>
    %44 = tpu.matmul %42, %43, %cst_25 {dimension_numbers = #tpu.dot_dimension_numbers<[1], [0], [0], [1], [0, 0, 1, 1], [], []>} : vector<8x128xbf16>, vector<128x512xbf16>, vector<8x512xf32> -> vector<8x512xf32>
    %45 = arith.addf %40, %44 : vector<8x512xf32>
    %c0_26 = arith.constant 0 : index
    %c0_27 = arith.constant 0 : index
    %46 = vector.load %arg9[%c0_26, %c0_27] : memref<1x512xf32, #tpu.memory_space<vmem>>, vector<1x512xf32>
    %47 = vector.broadcast %46 : vector<1x512xf32> to vector<8x512xf32>
    %48 = arith.addf %45, %47 : vector<8x512xf32>
    %c0_28 = arith.constant 0 : index
    %c0_29 = arith.constant 0 : index
    %49 = vector.load %arg18[%c0_28, %c0_29] : memref<8x128xf32, #tpu.memory_space<vmem>>, vector<8x128xf32>
    %50 = vector.extract_strided_slice %48 {offsets = [0, 0], sizes = [8, 256], strides = [1, 1]} : vector<8x512xf32> to vector<8x256xf32>
    %cst_30 = arith.constant 0.000000e+00 : f32
    %51 = vector.broadcast %cst_30 : f32 to vector<8x256xf32>
    %52 = arith.subf %51, %50 : vector<8x256xf32>
    %53 = math.exp %52 : vector<8x256xf32>
    %cst_31 = arith.constant 1.000000e+00 : f32
    %54 = vector.broadcast %cst_31 : f32 to vector<8x256xf32>
    %55 = arith.addf %54, %53 : vector<8x256xf32>
    %56 = tpu.reciprocal %55 {approx = true} : vector<8x256xf32> -> vector<8x256xf32>
    %57 = vector.extract_strided_slice %56 {offsets = [0, 0], sizes = [8, 128], strides = [1, 1]} : vector<8x256xf32> to vector<8x128xf32>
    %58 = vector.extract_strided_slice %56 {offsets = [0, 128], sizes = [8, 128], strides = [1, 1]} : vector<8x256xf32> to vector<8x128xf32>
    %59 = vector.extract_strided_slice %48 {offsets = [0, 256], sizes = [8, 128], strides = [1, 1]} : vector<8x512xf32> to vector<8x128xf32>
    %60 = math.tanh %59 : vector<8x128xf32>
    %61 = vector.extract_strided_slice %48 {offsets = [0, 384], sizes = [8, 128], strides = [1, 1]} : vector<8x512xf32> to vector<8x128xf32>
    %cst_32 = arith.constant 0.000000e+00 : f32
    %62 = vector.broadcast %cst_32 : f32 to vector<8x128xf32>
    %63 = arith.subf %62, %61 : vector<8x128xf32>
    %64 = math.exp %63 : vector<8x128xf32>
    %cst_33 = arith.constant 1.000000e+00 : f32
    %65 = vector.broadcast %cst_33 : f32 to vector<8x128xf32>
    %66 = arith.addf %65, %64 : vector<8x128xf32>
    %67 = tpu.reciprocal %66 {approx = true} : vector<8x128xf32> -> vector<8x128xf32>
    %68 = arith.mulf %58, %49 : vector<8x128xf32>
    %69 = arith.mulf %57, %60 : vector<8x128xf32>
    %70 = arith.addf %68, %69 : vector<8x128xf32>
    %71 = math.tanh %70 : vector<8x128xf32>
    %72 = arith.mulf %67, %71 : vector<8x128xf32>
    %c0_34 = arith.constant 0 : index
    %c0_35 = arith.constant 0 : index
    %73 = vector.load %arg17[%c0_34, %c0_35] : memref<8x128xf32, #tpu.memory_space<vmem>>, vector<8x128xf32>
    tpu.vector_store %arg17[%c0_34, %c0_35], %72 {strides = array<i32>} : memref<8x128xf32, #tpu.memory_space<vmem>>, vector<8x128xf32>,
    %c0_36 = arith.constant 0 : index
    %c0_37 = arith.constant 0 : index
    %74 = vector.load %arg18[%c0_36, %c0_37] : memref<8x128xf32, #tpu.memory_space<vmem>>, vector<8x128xf32>
    tpu.vector_store %arg18[%c0_36, %c0_37], %70 {strides = array<i32>} : memref<8x128xf32, #tpu.memory_space<vmem>>, vector<8x128xf32>,
    %75 = arith.truncf %72 : vector<8x128xf32> to vector<8x128xbf16>
    %c0_38 = arith.constant 0 : index
    %c0_39 = arith.constant 0 : index
    %76 = vector.load %arg10[%c0_38, %c0_39] : memref<128x256xbf16, #tpu.memory_space<vmem>>, vector<128x256xbf16>
    %cst_40 = arith.constant dense<0.000000e+00> : vector<8x256xf32>
    %77 = tpu.matmul %75, %76, %cst_40 {dimension_numbers = #tpu.dot_dimension_numbers<[1], [0], [0], [1], [0, 0, 1, 1], [], []>} : vector<8x128xbf16>, vector<128x256xbf16>, vector<8x256xf32> -> vector<8x256xf32>
    %c0_41 = arith.constant 0 : index
    %c0_42 = arith.constant 0 : index
    %78 = vector.load %arg11[%c0_41, %c0_42] : memref<1x256xf32, #tpu.memory_space<vmem>>, vector<1x256xf32>
    %79 = vector.broadcast %78 : vector<1x256xf32> to vector<8x256xf32>
    %80 = arith.addf %77, %79 : vector<8x256xf32>
    %c0_43 = arith.constant 0 : index
    %c0_44 = arith.constant 0 : index
    %81 = vector.load %arg12[%c0_43, %c0_44] : memref<8x256xf32, #tpu.memory_space<vmem>>, vector<8x256xf32>
    tpu.vector_store %arg12[%c0_43, %c0_44], %80 {strides = array<i32>} : memref<8x256xf32, #tpu.memory_space<vmem>>, vector<8x256xf32>,
    return
  }
  func.func @transform_0(%arg0: i32, %arg1: memref<8x10xi32, #tpu.memory_space<smem>>) -> (i32, i32) {
    %c0_i32 = arith.constant 0 : i32
    %c0_i32_0 = arith.constant 0 : i32
    %c0_i32_1 = arith.constant 0 : i32
    return %c0_i32, %c0_i32_0 : i32, i32
  }
  func.func @transform_1(%arg0: i32, %arg1: memref<8x10xi32, #tpu.memory_space<smem>>) -> (i32, i32) {
    %c0_i32 = arith.constant 0 : i32
    %c0_i32_0 = arith.constant 0 : i32
    %c0_i32_1 = arith.constant 0 : i32
    return %c0_i32, %c0_i32_0 : i32, i32
  }
  func.func @transform_2(%arg0: i32, %arg1: memref<8x10xi32, #tpu.memory_space<smem>>) -> (i32, i32) {
    %c0_i32 = arith.constant 0 : i32
    %c0_i32_0 = arith.constant 0 : i32
    %c0_i32_1 = arith.constant 0 : i32
    return %c0_i32, %c0_i32_0 : i32, i32
  }
  func.func @transform_3(%arg0: i32, %arg1: memref<8x10xi32, #tpu.memory_space<smem>>) -> (i32, i32) {
    %c0_i32 = arith.constant 0 : i32
    %c0_i32_0 = arith.constant 0 : i32
    %c0_i32_1 = arith.constant 0 : i32
    return %c0_i32, %c0_i32_0 : i32, i32
  }
  func.func @transform_4(%arg0: i32, %arg1: memref<8x10xi32, #tpu.memory_space<smem>>) -> (i32, i32) {
    %c0_i32 = arith.constant 0 : i32
    %c0_i32_0 = arith.constant 0 : i32
    %c0_i32_1 = arith.constant 0 : i32
    return %c0_i32, %c0_i32_0 : i32, i32
  }
  func.func @transform_5(%arg0: i32, %arg1: memref<8x10xi32, #tpu.memory_space<smem>>) -> (i32, i32) {
    %c0_i32 = arith.constant 0 : i32
    %c0_i32_0 = arith.constant 0 : i32
    %c0_i32_1 = arith.constant 0 : i32
    return %c0_i32, %c0_i32_0 : i32, i32
  }
  func.func @transform_6(%arg0: i32, %arg1: memref<8x10xi32, #tpu.memory_space<smem>>) -> (i32, i32) {
    %c0_i32 = arith.constant 0 : i32
    %c0_i32_0 = arith.constant 0 : i32
    %c0_i32_1 = arith.constant 0 : i32
    return %c0_i32, %c0_i32_0 : i32, i32
  }
  func.func @transform_7(%arg0: i32, %arg1: memref<8x10xi32, #tpu.memory_space<smem>>) -> (i32, i32) {
    %c0_i32 = arith.constant 0 : i32
    %c0_i32_0 = arith.constant 0 : i32
    %c0_i32_1 = arith.constant 0 : i32
    return %c0_i32, %c0_i32_0 : i32, i32
  }
  func.func @transform_8(%arg0: i32, %arg1: memref<8x10xi32, #tpu.memory_space<smem>>) -> (i32, i32) {
    %c0_i32 = arith.constant 0 : i32
    %c0_i32_0 = arith.constant 0 : i32
    %c0_i32_1 = arith.constant 0 : i32
    return %c0_i32, %c0_i32_0 : i32, i32
  }
  func.func @transform_9(%arg0: i32, %arg1: memref<8x10xi32, #tpu.memory_space<smem>>) -> (i32, i32) {
    %c0_i32 = arith.constant 0 : i32
    %c0_i32_0 = arith.constant 0 : i32
    %c0_i32_1 = arith.constant 0 : i32
    return %c0_i32, %c0_i32_0 : i32, i32
  }
  func.func @transform_10(%arg0: i32, %arg1: memref<8x10xi32, #tpu.memory_space<smem>>) -> (i32, i32) {
    %c0_i32 = arith.constant 0 : i32
    %c0_i32_0 = arith.constant 0 : i32
    return %c0_i32, %arg0 : i32, i32
  }
}

</mosaic_0001>

<bundles_post_ra>
// kernel: decoder_forward.1
= control target key start
LH: loop header
LB: loop body
LE: loop exit
PB: predicated region body
PF: predicated region fallthrough
CT: control target
= control target key end

     0   :  { %s4784_s0 = inlined_call_operand.vmem [shape: s32[8,10], index: 0, kind: input, shape index: {}]   ;;  %s4785_s1 = inlined_call_operand.vmem [shape: f32[8,128], index: 1, kind: input, shape index: {}]   ;;  %s4786_s2 = inlined_call_operand.hbm [shape: bf16[256,128], index: 2, kind: input, shape index: {}]   ;;  %s4787_s3 = inlined_call_operand.hbm [shape: bf16[128,512], index: 3, kind: input, shape index: {}]   ;;  %s4788_s4 = inlined_call_operand.hbm [shape: bf16[128,512], index: 4, kind: input, shape index: {}]   ;;  %s4789_s5 = inlined_call_operand.hbm [shape: f32[1,512], index: 5, kind: input, shape index: {}]   ;;  %s4790_s6 = inlined_call_operand.hbm [shape: bf16[128,512], index: 6, kind: input, shape index: {}]   ;;  %s4791_s7 = inlined_call_operand.hbm [shape: bf16[128,512], index: 7, kind: input, shape index: {}]   ;;  %s4792_s8 = inlined_call_operand.hbm [shape: f32[1,512], index: 8, kind: input, shape index: {}]   ;;  %s4793_s9 = inlined_call_operand.hbm [shape: bf16[128,256], index: 9, kind: input, shape index: {}]   ;;  %s4794_s10 = inlined_call_operand.vmem [shape: f32[1,256], index: 10, kind: input, shape index: {}]   ;;  %s4795_s11 = inlined_call_operand.hbm [shape: f32[8,2560], index: 11, kind: output, shape index: {}]  }
   0x1   :  { %s16_s19 = sshll.u32 %s4784_s0, 4  ;;  %s17_s19 = int_to_ptr.vmem [resolvable:$true] %s16_s19 }
   0x2   :  { %s3696_s20 = scalar_lea.vmem %s17_s19, 128  ;;  %p3701_p1 = scmp.lt.s32.totalorder %s17_s19, %s17_s19 }
   0x3   :  { %p3697_p0 = scmp.ne.s32.totalorder %s17_s19, %s3696_s20  ;;  %p3702_p2 = scmp.lt.s32.totalorder %s3696_s20, %s3696_s20 }
   0x5   :  { %p3703_p3 = por %p3702_p2, %p3701_p1 }
   0x7   :  { %p3704_p4 = pnand %p3703_p3, %p3697_p0 }
   0x9   :  { %3707 = shalt.err (!%p3704_p4)  }
   0xa   :  { %s4018_s21 = smov [#allocation9]  }
   0xb   :  { %19 = dma.vmem_to_smem %s17_s19, 128, %s4018_s21, [#allocation8] }
   0xc   :  { %3976 = dma.done.wait [#allocation8], 128 }
   0xd   :  { %3977 = vsyncadd [#allocation8], 4294967168 }
   0xe   :  { %21 = sfence }
   0xf   :  { %22 = vsyncpa [#allocation11], 0 }
  0x10   :  { %23 = vsyncpa [#allocation14], 0 }
  0x11   :  { %24 = vsyncpa [#allocation17], 0 }
  0x12   :  { %25 = vsyncpa [#allocation20], 0 }
  0x13   :  { %26 = vsyncpa [#allocation23], 0 }
  0x14   :  { %27 = vsyncpa [#allocation12], 0 }
  0x15   :  { %29 = vsyncpa [#allocation12 + $0x1], 0  ;;  %s4101_s0 = smov 0   ;;  %s4103_s22 = smov 0  }
  0x16   :  { %s4105_s23 = smov 0   ;;  %s4107_s24 = smov 0  }
  0x17 LB: > { %4809 = sst [smem:[#allocation32_spill]] %s4004_s0  ;;  %s4122_s25 = sadd.s32 4294967295, %s4016_s24   ;;  %s4016_s24 = sphi %s4107_s24, %s4839_s24   ;;  %s4012_s23 = sphi %s4105_s23, %s4841_s23   ;;  %s4008_s22 = sphi %s4103_s22, %s4843_s22   ;;  %s4004_s0 = sphi %s4101_s0, %s4842_s0  }
  0x18   : > { %4810 = sst [smem:[#allocation33_spill]] %s4012_s23  ;;  %s3051_s26 = sadd.s32 4294967294, %s4016_s24  }
  0x19   : > { %4811 = sst [smem:[#allocation34_spill]] %s4016_s24  ;;  %s4126_s27 = sadd.s32 1, %s4016_s24  }
  0x1a   : > { %4812 = sst [smem:[#allocation35_spill]] %s4126_s27  ;;  %s252_s28 = sadd.s32 1, %s4012_s23 }
  0x1b   : > { %s249_s29 = ssub.s32 %s4016_s24, %s4126_s27  ;;  %p262_p5 = scmp.ne.s32.totalorder %s4012_s23, %s4008_s22 }
  0x1c   : > { %p250_p6 = scmp.eq.s32.totalorder %s249_s29, 0  ;;  %p263_p7 = scmp.eq.s32.totalorder %s4122_s25, 9 }
  0x1d   : > { %p268_p8 = scmp.ne.s32.totalorder %s4008_s22, %s4004_s0  ;;  %p269_p9 = scmp.eq.s32.totalorder %s3051_s26, 9 }
  0x1e   : > { %s4137_s30 = scalar_select %p250_p6, %s4012_s23, %s252_s28  }
  0x1f   : > { %p4139_p10 = por %p263_p7, %p262_p5  ;;  %p4143_p11 = por %p269_p9, %p268_p8 }
  0x20   : > { %4813 = sst [smem:[#allocation36_spill]] %s4137_s30  ;;  %p3052_p12 = scmp.ge.s32.totalorder %s4016_s24, 1 }
  0x21   : > { %s4814_s12 = scalar_select %p4139_p10, 1, 0 }
  0x22   : > { %s4815_s13 = scalar_select %p4143_p11, 1, 0 }
  0x23   : > { %p276_p13 = scmp.lt.s32.totalorder %s4016_s24, 11  ;;  %p4797_p1 = scmp.eq.s32.totalorder %s4122_s25, 0 }
  0x24   : > { %4816 = sst [smem:[#allocation37_spill]] %s4815_s13  ;;  %s4019_s15 = smov [#allocation13]  }
  0x25   : > { %p4151_p2 = pnand %p3052_p12, %p276_p13  ;;  %s304_s16 = sshll.u32 %s4019_s15, 4  ;;  %s4157_s16 = int_to_ptr.vmem [resolvable:$true] %s304_s16 }
  0x26   : > { %s4020_s18 = smov [#allocation16]   ;;  %s4021_s20 = smov [#allocation19]  }
  0x27   : > { %s4817_s14 = scalar_select %p4151_p2, 1, 0 }
  0x28   : > { %p3335_p3 = pneg %p4151_p2  ;;  %s331_s19 = sshll.u32 %s4020_s18, 4  ;;  %s4165_s19 = int_to_ptr.vmem [resolvable:$true] %s331_s19 }
  0x29   : > { %s4167_s21 = sshll.u32 %s4021_s20, 4  ;;  %s3708_s29 = scalar_lea.hbm %s4787_s3, 4096  ;;  %s355_s21 = int_to_ptr.vmem [resolvable:$true] %s4167_s21 }
  0x2a   : > { %p4161_p4 = pnand %p4797_p1, %p3335_p3  ;;  %p3709_p5 = scmp.ne.s32.totalorder %s4787_s3, %s3708_s29 }
  0x2b   : > { %p3715_p9 = scmp.lt.u32.totalorder %s3708_s29, %s4787_s3 }
  0x2c   : > { %p4177_p6 = pneg %p4161_p4 }
  0x2e   : > { %p3711_p7 = pnand %p4177_p6, %p3709_p5 }
  0x30   : > { %p3712_p8 = pneg %p3711_p7 }
  0x32   : > { %p3717_p12 = pnand %p3715_p9, %p3712_p8 }
  0x34   : > { %3720 = shalt.err (!%p3717_p12)
}
  0x35   : > { %s3721_s30 = scalar_lea.vmem %s4157_s16, 4096  ;;  %p3729_p1 = scmp.lt.s32.totalorder %s4157_s16, %s4157_s16 }
  0x36   : > { %p3722_p13 = scmp.ne.s32.totalorder %s4157_s16, %s3721_s30  ;;  %p3730_p11 = scmp.lt.s32.totalorder %s3721_s30, %s3721_s30 }
  0x38   : > { %p3724_p3 = pnand %p3722_p13, %p4177_p6  ;;  %p3731_p5 = por %p3730_p11, %p3729_p1 }
  0x3a   : > { %p3725_p0 = pneg %p3724_p3 }
  0x3c   : > { %p3732_p7 = pnand %p3731_p5, %p3725_p0 }
  0x3e   : > { %3735 = shalt.err (!%p3732_p7)
}
  0x3f   : > { %s4805_s26 = smov 256   ;;  %s4807_s28 = smov 16  }
  0x40   : > { %3341 = dma.hbm_to_vmem [thread:$0]  (!%p4161_p4), %s4787_s3, 4096, %s4157_s16, [#allocation14], %s4805_s26, %s4805_s26, %s4807_s28  }
  0x41   : > { %s3736_s30 = scalar_lea.hbm %s4789_s5, 64 }
  0x42   : > { %p3737_p11 = scmp.ne.s32.totalorder %s4789_s5, %s3736_s30  ;;  %p3743_p8 = scmp.lt.u32.totalorder %s3736_s30, %s4789_s5 }
  0x44   : > { %p3739_p0 = pnand %p3737_p11, %p4177_p6 }
  0x46   : > { %p3740_p1 = pneg %p3739_p0 }
  0x48   : > { %p3745_p9 = pnand %p3743_p8, %p3740_p1 }
  0x4a   : > { %3748 = shalt.err (!%p3745_p9)
}
  0x4b   : > { %s3749_s16 = scalar_lea.vmem %s4165_s19, 64  ;;  %p3757_p5 = scmp.lt.s32.totalorder %s4165_s19, %s4165_s19 }
  0x4c   : > { %p3750_p12 = scmp.ne.s32.totalorder %s4165_s19, %s3749_s16  ;;  %p3758_p7 = scmp.lt.s32.totalorder %s3749_s16, %s3749_s16 }
  0x4e   : > { %p3752_p13 = pnand %p3750_p12, %p4177_p6  ;;  %p3759_p11 = por %p3758_p7, %p3757_p5 }
  0x50   : > { %p3753_p3 = pneg %p3752_p13 }
  0x52   : > { %p3760_p0 = pnand %p3759_p11, %p3753_p3 }
  0x54   : > { %3763 = shalt.err (!%p3760_p0)
}
  0x55   : > { %3347 = dma.hbm_to_vmem [thread:$0]  (!%p4161_p4), %s4789_s5, 64, %s4165_s19, [#allocation17]  }
  0x56   : > { %s3764_s29 = scalar_lea.hbm %s4791_s7, 4096 }
  0x57   : > { %p3765_p1 = scmp.ne.s32.totalorder %s4791_s7, %s3764_s29  ;;  %p3771_p12 = scmp.lt.u32.totalorder %s3764_s29, %s4791_s7 }
  0x59   : > { %p3767_p8 = pnand %p3765_p1, %p4177_p6 }
  0x5b   : > { %p3768_p9 = pneg %p3767_p8 }
  0x5d   : > { %p3773_p13 = pnand %p3771_p12, %p3768_p9 }
  0x5f   : > { %3776 = shalt.err (!%p3773_p13)
}
  0x60   : > { %s3777_s16 = scalar_lea.vmem %s355_s21, 4096  ;;  %p3785_p11 = scmp.lt.s32.totalorder %s355_s21, %s355_s21 }
  0x61   : > { %p3778_p3 = scmp.ne.s32.totalorder %s355_s21, %s3777_s16  ;;  %p3786_p0 = scmp.lt.s32.totalorder %s3777_s16, %s3777_s16 }
  0x63   : > { %p3780_p5 = pnand %p3778_p3, %p4177_p6  ;;  %p3787_p10 = por %p3786_p0, %p3785_p11 }
  0x65   : > { %p3781_p7 = pneg %p3780_p5 }
  0x67   : > { %p3788_p2 = pnand %p3787_p10, %p3781_p7 }
  0x69   : > { %3791 = shalt.err (!%p3788_p2)
}
  0x6a   : > { %3353 = dma.hbm_to_vmem [thread:$0]  (!%p4161_p4), %s4791_s7, 4096, %s355_s21, [#allocation20], %s4805_s26, %s4805_s26, %s4807_s28  }
  0x6b   : > { %s4024_s24 = smov [#allocation10]   ;;  %s3792_s15 = scalar_lea.hbm %s4786_s2, 2048 }
  0x6c   : > { %s291_s27 = sshll.u32 %s4024_s24, 4  ;;  %p3793_p10 = scmp.ne.s32.totalorder %s4786_s2, %s3792_s15  ;;  %s292_s27 = int_to_ptr.vmem [resolvable:$true] %s291_s27 }
  0x6d   : > { %p3799_p8 = scmp.lt.u32.totalorder %s3792_s15, %s4786_s2 }
  0x6e   : > { %p3795_p2 = pnand %p3793_p10, %p4177_p6 }
  0x70   : > { %p3796_p1 = pneg %p3795_p2 }
  0x72   : > { %p3801_p9 = pnand %p3799_p8, %p3796_p1 }
  0x74   : > { %3804 = shalt.err (!%p3801_p9)
}
  0x75   : > { %s3805_s21 = scalar_lea.vmem %s292_s27, 2048  ;;  %p3813_p5 = scmp.lt.s32.totalorder %s292_s27, %s292_s27 }
  0x76   : > { %p3806_p12 = scmp.ne.s32.totalorder %s292_s27, %s3805_s21  ;;  %p3814_p7 = scmp.lt.s32.totalorder %s3805_s21, %s3805_s21 }
  0x78   : > { %p3808_p13 = pnand %p3806_p12, %p4177_p6  ;;  %p3815_p11 = por %p3814_p7, %p3813_p5 }
  0x7a   : > { %p3809_p3 = pneg %p3808_p13 }
  0x7c   : > { %p3816_p0 = pnand %p3815_p11, %p3809_p3 }
  0x7e   : > { %3819 = shalt.err (!%p3816_p0)
}
  0x7f   : > { %s4025_s19 = smov 64   ;;  %s4026_s0 = smov 4  }
  0x80   : > { %3338 = dma.hbm_to_vmem [thread:$0]  (!%p4161_p4), %s4786_s2, 2048, %s292_s27, [#allocation11], %s4025_s19, %s4025_s19, %s4026_s0  }
  0x81   : > { %s4027_s29 = smov [#allocation15]   ;;  %s4028_s18 = smov [#allocation18]  }
  0x82   : > { %s317_s15 = sshll.u32 %s4027_s29, 4  ;;  %s341_s20 = sshll.u32 %s4028_s18, 4  ;;  %s318_s15 = int_to_ptr.vmem [resolvable:$true] %s317_s15  ;;  %s4264_s20 = int_to_ptr.vmem [resolvable:$true] %s341_s20 }
  0x83   : > { %s3820_s21 = scalar_lea.hbm %s4788_s4, 4096 }
  0x84   : > { %p3821_p10 = scmp.ne.s32.totalorder %s4788_s4, %s3820_s21  ;;  %p3827_p8 = scmp.lt.u32.totalorder %s3820_s21, %s4788_s4 }
  0x86   : > { %p3823_p2 = pnand %p3821_p10, %p4177_p6 }
  0x88   : > { %p3824_p1 = pneg %p3823_p2 }
  0x8a   : > { %p3829_p9 = pnand %p3827_p8, %p3824_p1 }
  0x8c   : > { %3832 = shalt.err (!%p3829_p9)
}
  0x8d   : > { %s3833_s19 = scalar_lea.vmem %s318_s15, 4096  ;;  %p3841_p5 = scmp.lt.s32.totalorder %s318_s15, %s318_s15 }
  0x8e   : > { %p3834_p12 = scmp.ne.s32.totalorder %s318_s15, %s3833_s19  ;;  %p3842_p7 = scmp.lt.s32.totalorder %s3833_s19, %s3833_s19 }
  0x90   : > { %p3836_p13 = pnand %p3834_p12, %p4177_p6  ;;  %p3843_p11 = por %p3842_p7, %p3841_p5 }
  0x92   : > { %p3837_p3 = pneg %p3836_p13 }
  0x94   : > { %p3844_p0 = pnand %p3843_p11, %p3837_p3 }
  0x96   : > { %3847 = shalt.err (!%p3844_p0)
}
  0x97   : > { %s4820_s26 = smov 16   ;;  %s4821_s28 = smov 256  }
  0x98   : > { %3344 = dma.hbm_to_vmem [thread:$0]  (!%p4161_p4), %s4788_s4, 4096, %s318_s15, [#allocation14], %s4821_s28, %s4821_s28, %s4820_s26  }
  0x99   : > { %s3848_s30 = scalar_lea.hbm %s4790_s6, 4096 }
  0x9a   : > { %p3849_p10 = scmp.ne.s32.totalorder %s4790_s6, %s3848_s30  ;;  %p3855_p8 = scmp.lt.u32.totalorder %s3848_s30, %s4790_s6 }
  0x9c   : > { %p3851_p2 = pnand %p3849_p10, %p4177_p6 }
  0x9e   : > { %p3852_p1 = pneg %p3851_p2 }
  0xa0   : > { %p3857_p9 = pnand %p3855_p8, %p3852_p1 }
  0xa2   : > { %3860 = shalt.err (!%p3857_p9)
}
  0xa3   : > { %s3861_s15 = scalar_lea.vmem %s4264_s20, 4096  ;;  %p3869_p5 = scmp.lt.s32.totalorder %s4264_s20, %s4264_s20 }
  0xa4   : > { %p3862_p12 = scmp.ne.s32.totalorder %s4264_s20, %s3861_s15  ;;  %p3870_p7 = scmp.lt.s32.totalorder %s3861_s15, %s3861_s15 }
  0xa6   : > { %p3864_p13 = pnand %p3862_p12, %p4177_p6  ;;  %p3871_p11 = por %p3870_p7, %p3869_p5 }
  0xa8   : > { %p3865_p3 = pneg %p3864_p13 }
  0xaa   : > { %p3872_p0 = pnand %p3871_p11, %p3865_p3 }
  0xac   : > { %3875 = shalt.err (!%p3872_p0)
}
  0xad   : > { %3350 = dma.hbm_to_vmem [thread:$0]  (!%p4161_p4), %s4790_s6, 4096, %s4264_s20, [#allocation17], %s4821_s28, %s4821_s28, %s4820_s26  }
  0xae   : > { %s4029_s13 = smov [#allocation21]   ;;  %s4030_s18 = smov [#allocation22]  }
  0xaf   : > { %s368_s29 = sshll.u32 %s4029_s13, 4  ;;  %s378_s30 = sshll.u32 %s4030_s18, 4  ;;  %s369_s29 = int_to_ptr.vmem [resolvable:$true] %s368_s29  ;;  %s4313_s30 = int_to_ptr.vmem [resolvable:$true] %s378_s30 }
  0xb0   : > { %s3876_s24 = scalar_lea.hbm %s4792_s8, 64 }
  0xb1   : > { %p3877_p10 = scmp.ne.s32.totalorder %s4792_s8, %s3876_s24  ;;  %p3883_p8 = scmp.lt.u32.totalorder %s3876_s24, %s4792_s8 }
  0xb3   : > { %p3879_p2 = pnand %p3877_p10, %p4177_p6 }
  0xb5   : > { %p3880_p1 = pneg %p3879_p2 }
  0xb7   : > { %p3885_p9 = pnand %p3883_p8, %p3880_p1 }
  0xb9   : > { %3888 = shalt.err (!%p3885_p9)
}
  0xba   : > { %s3889_s26 = scalar_lea.vmem %s369_s29, 64  ;;  %p3897_p5 = scmp.lt.s32.totalorder %s369_s29, %s369_s29 }
  0xbb   : > { %p3890_p12 = scmp.ne.s32.totalorder %s369_s29, %s3889_s26  ;;  %p3898_p7 = scmp.lt.s32.totalorder %s3889_s26, %s3889_s26 }
  0xbd   : > { %p3892_p13 = pnand %p3890_p12, %p4177_p6  ;;  %p3899_p11 = por %p3898_p7, %p3897_p5 }
  0xbf   : > { %p3893_p3 = pneg %p3892_p13 }
  0xc1   : > { %p3900_p0 = pnand %p3899_p11, %p3893_p3 }
  0xc3   : > { %3903 = shalt.err (!%p3900_p0)
}
  0xc4   : > { %3356 = dma.hbm_to_vmem [thread:$0]  (!%p4161_p4), %s4792_s8, 64, %s369_s29, [#allocation20]  }
  0xc5   : > { %s3904_s16 = scalar_lea.hbm %s4793_s9, 2048 }
  0xc6   : > { %p3905_p10 = scmp.ne.s32.totalorder %s4793_s9, %s3904_s16  ;;  %p3911_p8 = scmp.lt.u32.totalorder %s3904_s16, %s4793_s9 }
  0xc8   : > { %p3907_p2 = pnand %p3905_p10, %p4177_p6 }
  0xca   : > { %p3908_p1 = pneg %p3907_p2 }
  0xcc   : > { %p3913_p9 = pnand %p3911_p8, %p3908_p1 }
  0xce   : > { %3916 = shalt.err (!%p3913_p9)
}
  0xcf   : > { %s3917_s29 = scalar_lea.vmem %s4313_s30, 2048  ;;  %p3925_p5 = scmp.lt.s32.totalorder %s4313_s30, %s4313_s30 }
  0xd0   : > { %p3918_p12 = scmp.ne.s32.totalorder %s4313_s30, %s3917_s29  ;;  %p3926_p7 = scmp.lt.s32.totalorder %s3917_s29, %s3917_s29 }
  0xd2   : > { %p3920_p13 = pnand %p3918_p12, %p4177_p6  ;;  %p3927_p11 = por %p3926_p7, %p3925_p5 }
  0xd4   : > { %p3921_p3 = pneg %p3920_p13 }
  0xd6   : > { %p3928_p0 = pnand %p3927_p11, %p3921_p3 }
  0xd8   : > { %3931 = shalt.err (!%p3928_p0)
}
  0xd9   : > { %s4031_s19 = smov 128   ;;  %s4032_s20 = smov 8  }
  0xda   : > { %3359 = dma.hbm_to_vmem [thread:$0]  (!%p4161_p4), %s4793_s9, 2048, %s4313_s30, [#allocation23], %s4031_s19, %s4031_s19, %s4032_s20  }
  0xdb   : > { %p4822_p10 = scmp.ne.s32.totalorder %s4817_s14, 0 }
  0xdc   : > { %p4823_p6 = scmp.eq.s32.totalorder (!%p4822_p10), %s4122_s25, 0 }
  0xdd   : > { %397 = sbr.rel (%p4822_p10) target bundleno = 1692 (0x69c), region = 60 }
  0xe4   : > { %3979 = dma.done.wait (%p4823_p6), [#allocation11], 2048   ;;  %p4824_p2 = pmov %p4823_p6 }
  0xe6   : > { %3981 = vsyncadd (%p4824_p2), [#allocation11], 4294965248  ;;  %p4825_p1 = pmov %p4824_p2 }
  0xe8   : > { %3983 = dma.done.wait (%p4825_p1), [#allocation14], 8192   ;;  %p4826_p8 = pmov %p4825_p1 }
  0xe9   : > { %p4827_p9 = pmov %p4825_p1 }
  0xea   : > { %3985 = vsyncadd (%p4826_p8), [#allocation14], 4294959104 }
  0xeb   : > { %3987 = dma.done.wait (%p4827_p9), [#allocation17], 4160   ;;  %p4828_p4 = pmov %p4825_p1 }
  0xec   : > { %p4829_p12 = pmov %p4825_p1 }
  0xed   : > { %3989 = vsyncadd (%p4828_p4), [#allocation17], 4294963136 }
  0xee   : > { %3991 = dma.done.wait (%p4829_p12), [#allocation20], 4160   ;;  %p4830_p13 = pmov %p4825_p1 }
  0xef   : > { %p4831_p3 = pmov %p4825_p1 }
  0xf0   : > { %3993 = vsyncadd (%p4830_p13), [#allocation20], 4294963136 }
  0xf1   : > { %3995 = dma.done.wait (%p4831_p3), [#allocation23], 2048   ;;  %p4832_p5 = pmov %p4825_p1 }
  0xf2   : > { %s455_s23 = sand.u32 1, %s4008_s22   ;;  %p4833_p7 = scmp.ne.s32.totalorder %s4122_s25, 0 }
  0xf3   : > { %3997 = vsyncadd (%p4832_p5), [#allocation23], 4294965248  ;;  %s3070_s14 = sshll.u32 %s455_s23, 4  ;;  %v4385_v0 = vld [vmem:[#allocation13 + $0x4] ss:$16 sps:$4 sm:$0xff] (!%p4833_p7)   ;;  %v4033_v1 = vmov (!%p4833_p7), 0.0   ;;  %v534_v52 = vlaneseq (!%p4833_p7) }
  0xf4   : > { %s4381_s17 = scalar_lea.vmem [#allocation24], %s3070_s14  ;;  %463 = sbr.rel (%p4833_p7) target bundleno = 622 (0x26e), region = 96  ;;  %464 = vst [vmem:[#allocation4] sm:$0xff] (!%p4833_p7), %v4033_v1  ;;  %465 = vst [vmem:[#allocation5] sm:$0xff] (!%p4833_p7), %v4033_v1  ;;  %v4387_v2 = vld [vmem:[#allocation13 + $0xc] ss:$16 sps:$4 sm:$0xff] (!%p4833_p7)   ;;  %810 = vmatprep.subr.bf16.mxu0 (!%p4833_p7), %v4385_v0 }
  0xf5   : > { %466 = vst [vmem:[#allocation6] sm:$0xff] (!%p4833_p7), %v4033_v1  ;;  %467 = vst [vmem:[#allocation7] sm:$0xff] (!%p4833_p7), %v4033_v1  ;;  %v4034_v3 = vmov (!%p4833_p7), 0   ;;  %v4392_v4 = vld [vmem:[#allocation13] ss:$16 sps:$4 sm:$0xff] (!%p4833_p7)   ;;  %1003 = vmatprep.subr.bf16.mxu1 (!%p4833_p7), %v4387_v2  ;;  %v3481_v35 = vld [vmem:[#allocation10 + $0x8] sm:$0xff] (!%p4833_p7)  }
  0xf6   : > { %842 = vmatprep.mubr.bf16.mxu0 (!%p4833_p7), %v4034_v3  ;;  %1035 = vmatprep.mubr.bf16.mxu1 (!%p4833_p7), %v4034_v3  ;;  %v4394_v5 = vld [vmem:[#allocation13 + $0x8] ss:$16 sps:$4 sm:$0xff] (!%p4833_p7)   ;;  %v4397_v6 = vld [vmem:[#allocation13 + $0x24] ss:$16 sps:$4 sm:$0xff] (!%p4833_p7)   ;;  %v4401_v7 = vld [vmem:[#allocation13 + $0x2c] ss:$16 sps:$4 sm:$0xff] (!%p4833_p7)  }
  0xf7   : > { %811 = vmatpush1.bf16.msra.mxu0 (!%p4833_p7), %v4392_v4  ;;  %1004 = vmatpush1.bf16.msra.mxu1 (!%p4833_p7), %v4394_v5  ;;  %v4403_v8 = vld [vmem:[#allocation13 + $0x20] ss:$16 sps:$4 sm:$0xff] (!%p4833_p7)   ;;  %v4406_v9 = vld [vmem:[#allocation13 + $0x28] ss:$16 sps:$4 sm:$0xff] (!%p4833_p7)   ;;  %v4409_v10 = vld [vmem:[#allocation13 + $0x44] ss:$16 sps:$4 sm:$0xff] (!%p4833_p7)  }
  0xf8   : > { %812 = vmatprep.subr.bf16.mxu0 (!%p4833_p7), %v4397_v6  ;;  %1005 = vmatprep.subr.bf16.mxu1 (!%p4833_p7), %v4401_v7  ;;  %v4411_v11 = vld [vmem:[#allocation13 + $0x4c] ss:$16 sps:$4 sm:$0xff] (!%p4833_p7)   ;;  %v4413_v12 = vld [vmem:[#allocation13 + $0x40] ss:$16 sps:$4 sm:$0xff] (!%p4833_p7)   ;;  %v4415_v13 = vld [vmem:[#allocation13 + $0x48] ss:$16 sps:$4 sm:$0xff] (!%p4833_p7)  }
  0xf9   : > { %v4419_v14 = vld [vmem:[#allocation13 + $0x64] ss:$16 sps:$4 sm:$0xff] (!%p4833_p7)   ;;  %v4423_v15 = vld [vmem:[#allocation13 + $0x6c] ss:$16 sps:$4 sm:$0xff] (!%p4833_p7)   ;;  %v4425_v16 = vld [vmem:[#allocation13 + $0x60] ss:$16 sps:$4 sm:$0xff] (!%p4833_p7)  }
  0xfa   : > { %v3455_v17 = vld [vmem:[#allocation13 + $0x68] ss:$16 sps:$4 sm:$0xff] (!%p4833_p7)   ;;  %v3456_v18 = vld [vmem:[#allocation13 + $0x84] ss:$16 sps:$4 sm:$0xff] (!%p4833_p7)   ;;  %v3458_v19 = vld [vmem:[#allocation13 + $0x8c] ss:$16 sps:$4 sm:$0xff] (!%p4833_p7)  }
  0xfb   : > { %813 = vmatpush1.bf16.msra.mxu0 %v4403_v8  ;;  %1006 = vmatpush1.bf16.msra.mxu1 %v4406_v9  ;;  %v4431_v20 = vld [vmem:[#allocation13 + $0x80] ss:$16 sps:$4 sm:$0xff]   ;;  %v4433_v21 = vld [vmem:[#allocation13 + $0x88] ss:$16 sps:$4 sm:$0xff]   ;;  %v3462_v22 = vld [vmem:[#allocation13 + $0xa4] ss:$16 sps:$4 sm:$0xff]  }
  0xfc   : > { %814 = vmatprep.subr.bf16.mxu0 %v4409_v10  ;;  %1007 = vmatprep.subr.bf16.mxu1 %v4411_v11  ;;  %v3464_v23 = vld [vmem:[#allocation13 + $0xac] ss:$16 sps:$4 sm:$0xff]   ;;  %v3466_v24 = vld [vmem:[#allocation13 + $0xa0] ss:$16 sps:$4 sm:$0xff]   ;;  %v3467_v25 = vld [vmem:[#allocation13 + $0xa8] ss:$16 sps:$4 sm:$0xff]  }
  0xfd   : > { %v3468_v26 = vld [vmem:[#allocation13 + $0xc4] ss:$16 sps:$4 sm:$0xff]   ;;  %v3470_v27 = vld [vmem:[#allocation13 + $0xcc] ss:$16 sps:$4 sm:$0xff]   ;;  %v3472_v28 = vld [vmem:[#allocation13 + $0xc0] ss:$16 sps:$4 sm:$0xff]  }
  0xfe   : > { %v3473_v29 = vld [vmem:[#allocation13 + $0xc8] ss:$16 sps:$4 sm:$0xff]   ;;  %v3474_v30 = vld [vmem:[#allocation13 + $0xe4] ss:$16 sps:$4 sm:$0xff]   ;;  %v3476_v31 = vld [vmem:[#allocation13 + $0xec] ss:$16 sps:$4 sm:$0xff]  }
  0xff   : > { %815 = vmatpush1.bf16.msra.mxu0 %v4413_v12  ;;  %1008 = vmatpush1.bf16.msra.mxu1 %v4415_v13  ;;  %v3478_v32 = vld [vmem:[#allocation13 + $0xe0] ss:$16 sps:$4 sm:$0xff]   ;;  %v3479_v33 = vld [vmem:[#allocation13 + $0xe8] ss:$16 sps:$4 sm:$0xff]   ;;  %v4490_v53 = vshrl.u32 %v534_v52, 7 }
 0x100   : > { %816 = vmatprep.subr.bf16.mxu0 %v4419_v14  ;;  %1009 = vmatprep.subr.bf16.mxu1 %v4423_v15  ;;  %v3480_v34 = vld [vmem:[#allocation10] sm:$0xff]   ;;  %v3482_v36 = vld [vmem:[#allocation10 + $0x10] sm:$0xff]   ;;  %v3483_v37 = vld [vmem:[#allocation10 + $0x18] sm:$0xff]  }
 0x101   : > { %v3484_v38 = vld [vmem:[#allocation10 + $0x20] sm:$0xff]   ;;  %v3485_v39 = vld [vmem:[#allocation10 + $0x28] sm:$0xff]   ;;  %v3486_v40 = vld [vmem:[#allocation10 + $0x30] sm:$0xff]   ;;  %v536_v54 = vsub.s32 0, %v4490_v53  ;;  %v544_v55 = vsub.s32 2, %v4490_v53  ;;  %v540_v57 = vsub.s32 1, %v4490_v53 }
 0x102   : > { %v3487_v41 = vld [vmem:[#allocation10 + $0x38] sm:$0xff]   ;;  %v3488_v42 = vld [vmem:[#allocation10 + $0x40] sm:$0xff]   ;;  %v3489_v43 = vld [vmem:[#allocation10 + $0x48] sm:$0xff]   ;;  %v548_v58 = vsub.s32 3, %v4490_v53 }
 0x103   : > { %817 = vmatpush1.bf16.msra.mxu0 %v4425_v16  ;;  %1010 = vmatpush1.bf16.msra.mxu1 %v3455_v17  ;;  %v3490_v44 = vld [vmem:[#allocation10 + $0x50] sm:$0xff]   ;;  %v3491_v45 = vld [vmem:[#allocation10 + $0x58] sm:$0xff]   ;;  %v3492_v46 = vld [vmem:[#allocation10 + $0x60] sm:$0xff]  }
 0x104   : > { %818 = vmatprep.subr.bf16.mxu0 %v3456_v18  ;;  %1011 = vmatprep.subr.bf16.mxu1 %v3458_v19  ;;  %v3493_v47 = vld [vmem:[#allocation10 + $0x68] sm:$0xff]   ;;  %v3494_v48 = vld [vmem:[#allocation10 + $0x70] sm:$0xff]   ;;  %v3495_v49 = vld [vmem:[#allocation10 + $0x78] sm:$0xff]  }
 0x105   : > { %v1324_v50 = vld [vmem:[%s4785_s1] sm:$0xff]  ;;  %v532_v56 = vld [vmem:[#allocation16] sm:$0xf] }
 0x106   : > { %v1325_v51 = vpack.c.bf16 %v1324_v50, %v1324_v50  ;;  %v4498_v59 = vrot.slane %v532_v56, %v536_v54  ;;  %v4502_v60 = vrot.slane %v532_v56, %v544_v55  ;;  %v4506_v63 = vrot.slane %v532_v56, %v540_v57 }
 0x107   : > { %819 = vmatpush1.bf16.msra.mxu0 %v4431_v20  ;;  %1012 = vmatpush1.bf16.msra.mxu1 %v4433_v21 }
 0x108   : > { %820 = vmatprep.subr.bf16.mxu0 %v3462_v22  ;;  %1013 = vmatprep.subr.bf16.mxu1 %v3464_v23 }
 0x10b   : > { %821 = vmatpush1.bf16.msra.mxu0 %v3466_v24  ;;  %1014 = vmatpush1.bf16.msra.mxu1 %v3467_v25 }
 0x10c   : > { %822 = vmatprep.subr.bf16.mxu0 %v3468_v26  ;;  %1015 = vmatprep.subr.bf16.mxu1 %v3470_v27 }
 0x10f   : > { %823 = vmatpush1.bf16.msra.mxu0 %v3472_v28  ;;  %1016 = vmatpush1.bf16.msra.mxu1 %v3473_v29 }
 0x110   : > { %824 = vmatprep.subr.bf16.mxu0 %v3474_v30  ;;  %1017 = vmatprep.subr.bf16.mxu1 %v3476_v31 }
 0x113   : > { %825 = vmatpush1.bf16.msra.mxu0 %v3478_v32  ;;  %1018 = vmatpush1.bf16.msra.mxu1 %v3479_v33 }
 0x114   : > { %1540 = vmatprep.subr.bf16.mxu0 %v4385_v0  ;;  %1581 = vmatprep.subr.bf16.mxu1 %v4387_v2  ;;  %v4510_v0 = vrot.slane %v532_v56, %v548_v58 }
 0x116   : > { %843 = vmatmul.mubr.bf16.vlgmr.msra.gmra.mrb[0].mxu0 %v3480_v34  ;;  %1036 = vmatmul.mubr.bf16.vlgmr.msra.gmra.mrb[0].mxu1 %v3480_v34 }
 0x117   : > { %1541 = vmatpush1.bf16.msra.mxu0 %v4392_v4  ;;  %1582 = vmatpush1.bf16.msra.mxu1 %v4394_v5 }
 0x118   : > { %852 = vmatprep.mubr.bf16.mxu0 %v4034_v3  ;;  %1045 = vmatprep.mubr.bf16.mxu1 %v4034_v3 }
 0x119   : > { %1542 = vmatprep.subr.bf16.mxu0 %v4397_v6  ;;  %1583 = vmatprep.subr.bf16.mxu1 %v4401_v7 }
 0x11b   : > { %1543 = vmatpush1.bf16.msra.mxu0 %v4403_v8  ;;  %1584 = vmatpush1.bf16.msra.mxu1 %v4406_v9 }
 0x11c   : > { %1544 = vmatprep.subr.bf16.mxu0 %v4409_v10  ;;  %1585 = vmatprep.subr.bf16.mxu1 %v4411_v11 }
 0x11e   : > { %853 = vmatmul.mubr.bf16.gmra.mrb[4].mxu0 %v3481_v35  ;;  %1046 = vmatmul.mubr.bf16.gmra.mrb[4].mxu1 %v3481_v35 }
 0x11f   : > { %862 = vmatprep.mubr.bf16.mxu0 %v4034_v3  ;;  %1055 = vmatprep.mubr.bf16.mxu1 %v4034_v3 }
 0x120   : > { %1545 = vmatpush1.bf16.msra.mxu0 %v4413_v12  ;;  %1586 = vmatpush1.bf16.msra.mxu1 %v4415_v13 }
 0x121   : > { %1546 = vmatprep.subr.bf16.mxu0 %v4419_v14  ;;  %1587 = vmatprep.subr.bf16.mxu1 %v4423_v15 }
 0x124   : > { %1547 = vmatpush1.bf16.msra.mxu0 %v4425_v16  ;;  %1588 = vmatpush1.bf16.msra.mxu1 %v3455_v17 }
 0x125   : > { %1548 = vmatprep.subr.bf16.mxu0 %v3456_v18  ;;  %1589 = vmatprep.subr.bf16.mxu1 %v3458_v19 }
 0x126   : > { %863 = vmatmul.mubr.bf16.gmra.mrb[8].mxu0 %v3482_v36  ;;  %1056 = vmatmul.mubr.bf16.gmra.mrb[8].mxu1 %v3482_v36 }
 0x127   : > { %872 = vmatprep.mubr.bf16.mxu0 %v4034_v3  ;;  %1065 = vmatprep.mubr.bf16.mxu1 %v4034_v3 }
 0x128   : > { %1549 = vmatpush1.bf16.msra.mxu0 %v4431_v20  ;;  %1590 = vmatpush1.bf16.msra.mxu1 %v4433_v21 }
 0x129   : > { %1550 = vmatprep.subr.bf16.mxu0 %v3462_v22  ;;  %1591 = vmatprep.subr.bf16.mxu1 %v3464_v23 }
 0x12c   : > { %1551 = vmatpush1.bf16.msra.mxu0 %v3466_v24  ;;  %1592 = vmatpush1.bf16.msra.mxu1 %v3467_v25 }
 0x12d   : > { %1552 = vmatprep.subr.bf16.mxu0 %v3468_v26  ;;  %1593 = vmatprep.subr.bf16.mxu1 %v3470_v27 }
 0x12e   : > { %873 = vmatmul.mubr.bf16.gmra.mrb[12].mxu0 %v3483_v37  ;;  %1066 = vmatmul.mubr.bf16.gmra.mrb[12].mxu1 %v3483_v37 }
 0x12f   : > { %882 = vmatprep.mubr.bf16.mxu0 %v4034_v3  ;;  %1075 = vmatprep.mubr.bf16.mxu1 %v4034_v3 }
 0x130   : > { %1553 = vmatpush1.bf16.msra.mxu0 %v3472_v28  ;;  %1594 = vmatpush1.bf16.msra.mxu1 %v3473_v29 }
 0x131   : > { %1554 = vmatprep.subr.bf16.mxu0 %v3474_v30  ;;  %1595 = vmatprep.subr.bf16.mxu1 %v3476_v31 }
 0x134   : > { %1555 = vmatpush1.bf16.msra.mxu0 %v3478_v32  ;;  %1596 = vmatpush1.bf16.msra.mxu1 %v3479_v33 }
 0x136   : > { %883 = vmatmul.mubr.bf16.gmra.mrb[16].mxu0 %v3484_v38  ;;  %1076 = vmatmul.mubr.bf16.gmra.mrb[16].mxu1 %v3484_v38 }
 0x137   : > { %892 = vmatprep.mubr.bf16.mxu0 %v4034_v3  ;;  %1085 = vmatprep.mubr.bf16.mxu1 %v4034_v3 }
 0x13e   : > { %893 = vmatmul.mubr.bf16.gmra.mrb[20].mxu0 %v3485_v39  ;;  %1086 = vmatmul.mubr.bf16.gmra.mrb[20].mxu1 %v3485_v39 }
 0x13f   : > { %902 = vmatprep.mubr.bf16.mxu0 %v4034_v3  ;;  %1095 = vmatprep.mubr.bf16.mxu1 %v4034_v3 }
 0x146   : > { %903 = vmatmul.mubr.bf16.gmra.mrb[24].mxu0 %v3486_v40  ;;  %1096 = vmatmul.mubr.bf16.gmra.mrb[24].mxu1 %v3486_v40 }
 0x147   : > { %912 = vmatprep.mubr.bf16.mxu0 %v4034_v3  ;;  %1105 = vmatprep.mubr.bf16.mxu1 %v4034_v3 }
 0x14e   : > { %913 = vmatmul.mubr.bf16.gmra.mrb[28].mxu0 %v3487_v41  ;;  %1106 = vmatmul.mubr.bf16.gmra.mrb[28].mxu1 %v3487_v41 }
 0x14f   : > { %922 = vmatprep.mubr.bf16.mxu0 %v4034_v3  ;;  %1115 = vmatprep.mubr.bf16.mxu1 %v4034_v3 }
 0x156   : > { %923 = vmatmul.mubr.bf16.gmra.mrb[32].mxu0 %v3488_v42  ;;  %1116 = vmatmul.mubr.bf16.gmra.mrb[32].mxu1 %v3488_v42 }
 0x157   : > { %932 = vmatprep.mubr.bf16.mxu0 %v4034_v3  ;;  %1125 = vmatprep.mubr.bf16.mxu1 %v4034_v3 }
 0x15e   : > { %933 = vmatmul.mubr.bf16.gmra.mrb[36].mxu0 %v3489_v43  ;;  %1126 = vmatmul.mubr.bf16.gmra.mrb[36].mxu1 %v3489_v43 }
 0x15f   : > { %942 = vmatprep.mubr.bf16.mxu0 %v4034_v3  ;;  %1135 = vmatprep.mubr.bf16.mxu1 %v4034_v3 }
 0x166   : > { %943 = vmatmul.mubr.bf16.gmra.mrb[40].mxu0 %v3490_v44  ;;  %1136 = vmatmul.mubr.bf16.gmra.mrb[40].mxu1 %v3490_v44 }
 0x167   : > { %952 = vmatprep.mubr.bf16.mxu0 %v4034_v3  ;;  %1145 = vmatprep.mubr.bf16.mxu1 %v4034_v3 }
 0x16e   : > { %953 = vmatmul.mubr.bf16.gmra.mrb[44].mxu0 %v3491_v45  ;;  %1146 = vmatmul.mubr.bf16.gmra.mrb[44].mxu1 %v3491_v45 }
 0x16f   : > { %962 = vmatprep.mubr.bf16.mxu0 %v4034_v3  ;;  %1155 = vmatprep.mubr.bf16.mxu1 %v4034_v3 }
 0x176   : > { %963 = vmatmul.mubr.bf16.gmra.mrb[48].mxu0 %v3492_v46  ;;  %1156 = vmatmul.mubr.bf16.gmra.mrb[48].mxu1 %v3492_v46 }
 0x177   : > { %972 = vmatprep.mubr.bf16.mxu0 %v4034_v3  ;;  %1165 = vmatprep.mubr.bf16.mxu1 %v4034_v3 }
 0x17e   : > { %973 = vmatmul.mubr.bf16.gmra.mrb[52].mxu0 %v3493_v47  ;;  %1166 = vmatmul.mubr.bf16.gmra.mrb[52].mxu1 %v3493_v47 }
 0x17f   : > { %982 = vmatprep.mubr.bf16.mxu0 %v4034_v3  ;;  %1175 = vmatprep.mubr.bf16.mxu1 %v4034_v3 }
 0x186   : > { %983 = vmatmul.mubr.bf16.gmra.mrb[56].mxu0 %v3494_v48  ;;  %1176 = vmatmul.mubr.bf16.gmra.mrb[56].mxu1 %v3494_v48 }
 0x187   : > { %992 = vmatprep.mubr.bf16.mxu0 %v4034_v3  ;;  %1185 = vmatprep.mubr.bf16.mxu1 %v4034_v3 }
 0x18e   : > { %993 = vmatmul.mubr.bf16.gmra.mrb[60].mxu0 %v3495_v49  ;;  %1186 = vmatmul.mubr.bf16.gmra.mrb[60].mxu1 %v3495_v49 }
 0x18f   : > { %1572 = vmatprep.mubr.bf16.mxu0 %v4034_v3  ;;  %1613 = vmatprep.mubr.bf16.mxu1 %v4034_v3 }
 0x196   : > { %1573 = vmatmul.mubr.bf16.vlgmr.msra.gmra.mrb[64].mxu0 %v1325_v51  ;;  %1614 = vmatmul.mubr.bf16.vlgmr.msra.gmra.mrb[64].mxu1 %v1325_v51 }
 0x1e9   : > { %v844_v61 = vpop.f32.mrb[0].mxu0  ;;  %v1037_v62 = vpop.f32.mrb[0].mxu1 }
 0x1ea   : > { %v846_v1 = vpop.f32.mrb[1].mxu0  ;;  %v1039_v2 = vpop.f32.mrb[1].mxu1  ;;  %v845_v5 = vadd.f32 %v844_v61, %v4498_v59  ;;  %v1038_v6 = vadd.f32 %v1037_v62, %v4502_v60 }
 0x1eb   : > { %v848_v3 = vpop.f32.mrb[2].mxu0  ;;  %v1041_v4 = vpop.f32.mrb[2].mxu1  ;;  %v847_v11 = vadd.f32 %v846_v1, %v4506_v63  ;;  %v1040_v12 = vadd.f32 %v1039_v2, %v4510_v0 }
 0x1ec   : > { %v849_v7 = vadd.f32 %v848_v3, %v4498_v59  ;;  %v1042_v8 = vadd.f32 %v1041_v4, %v4502_v60  ;;  %v850_v9 = vpop.f32.mrb[3].mxu0  ;;  %v1043_v10 = vpop.f32.mrb[3].mxu1 }
 0x1ed   : > { %v851_v13 = vadd.f32 %v850_v9, %v4506_v63  ;;  %v1044_v14 = vadd.f32 %v1043_v10, %v4510_v0 }
 0x1ee   : > { %v1196_v15 = vpack.c.bf16 %v849_v7, %v845_v5  ;;  %v1198_v16 = vpack.c.bf16 %v1042_v8, %v1038_v6 }
 0x1ef   : > { %v1197_v17 = vpack.c.bf16 %v851_v13, %v847_v11  ;;  %v1199_v18 = vpack.c.bf16 %v1044_v14, %v1040_v12 }
 0x1f0   : > { %1260 = vst [vmem:[#allocation2] sm:$0xff] %v1196_v15  ;;  %1262 = vst [vmem:[#allocation2 + $0x10] sm:$0xff] %v1198_v16 }
 0x1f1   : > { %1261 = vst [vmem:[#allocation2 + $0x8] sm:$0xff] %v1197_v17  ;;  %1263 = vst [vmem:[#allocation2 + $0x18] sm:$0xff] %v1199_v18  ;;  %v854_v19 = vpop.f32.mrb[4].mxu0  ;;  %v1047_v20 = vpop.f32.mrb[4].mxu1 }
 0x1f2   : > { %v856_v21 = vpop.f32.mrb[5].mxu0  ;;  %v1049_v22 = vpop.f32.mrb[5].mxu1  ;;  %v855_v25 = vadd.f32 %v854_v19, %v4498_v59  ;;  %v1048_v26 = vadd.f32 %v1047_v20, %v4502_v60 }
 0x1f3   : > { %v858_v23 = vpop.f32.mrb[6].mxu0  ;;  %v1051_v24 = vpop.f32.mrb[6].mxu1  ;;  %v857_v31 = vadd.f32 %v856_v21, %v4506_v63  ;;  %v1050_v32 = vadd.f32 %v1049_v22, %v4510_v0 }
 0x1f4   : > { %v859_v27 = vadd.f32 %v858_v23, %v4498_v59  ;;  %v1052_v28 = vadd.f32 %v1051_v24, %v4502_v60  ;;  %v860_v29 = vpop.f32.mrb[7].mxu0  ;;  %v1053_v30 = vpop.f32.mrb[7].mxu1 }
 0x1f5   : > { %v861_v33 = vadd.f32 %v860_v29, %v4506_v63  ;;  %v1054_v34 = vadd.f32 %v1053_v30, %v4510_v0 }
 0x1f6   : > { %v1200_v35 = vpack.c.bf16 %v859_v27, %v855_v25  ;;  %v1202_v36 = vpack.c.bf16 %v1052_v28, %v1048_v26 }
 0x1f7   : > { %v1201_v37 = vpack.c.bf16 %v861_v33, %v857_v31  ;;  %v1203_v38 = vpack.c.bf16 %v1054_v34, %v1050_v32 }
 0x1f8   : > { %1264 = vst [vmem:[#allocation2 + $0x20] sm:$0xff] %v1200_v35  ;;  %1266 = vst [vmem:[#allocation2 + $0x30] sm:$0xff] %v1202_v36 }
 0x1f9   : > { %1265 = vst [vmem:[#allocation2 + $0x28] sm:$0xff] %v1201_v37  ;;  %1267 = vst [vmem:[#allocation2 + $0x38] sm:$0xff] %v1203_v38  ;;  %v864_v39 = vpop.f32.mrb[8].mxu0  ;;  %v1057_v40 = vpop.f32.mrb[8].mxu1 }
 0x1fa   : > { %v866_v41 = vpop.f32.mrb[9].mxu0  ;;  %v1059_v42 = vpop.f32.mrb[9].mxu1  ;;  %v865_v45 = vadd.f32 %v864_v39, %v4498_v59  ;;  %v1058_v46 = vadd.f32 %v1057_v40, %v4502_v60 }
 0x1fb   : > { %v868_v43 = vpop.f32.mrb[10].mxu0  ;;  %v1061_v44 = vpop.f32.mrb[10].mxu1  ;;  %v867_v51 = vadd.f32 %v866_v41, %v4506_v63  ;;  %v1060_v52 = vadd.f32 %v1059_v42, %v4510_v0 }
 0x1fc   : > { %v869_v47 = vadd.f32 %v868_v43, %v4498_v59  ;;  %v1062_v48 = vadd.f32 %v1061_v44, %v4502_v60  ;;  %v870_v49 = vpop.f32.mrb[11].mxu0  ;;  %v1063_v50 = vpop.f32.mrb[11].mxu1 }
 0x1fd   : > { %v871_v56 = vadd.f32 %v870_v49, %v4506_v63  ;;  %v1064_v61 = vadd.f32 %v1063_v50, %v4510_v0 }
 0x1fe   : > { %v1204_v62 = vpack.c.bf16 %v869_v47, %v865_v45  ;;  %v1206_v1 = vpack.c.bf16 %v1062_v48, %v1058_v46 }
 0x1ff   : > { %v1205_v2 = vpack.c.bf16 %v871_v56, %v867_v51  ;;  %v1207_v3 = vpack.c.bf16 %v1064_v61, %v1060_v52 }
 0x200   : > { %1268 = vst [vmem:[#allocation2 + $0x40] sm:$0xff] %v1204_v62  ;;  %1270 = vst [vmem:[#allocation2 + $0x50] sm:$0xff] %v1206_v1 }
 0x201   : > { %1269 = vst [vmem:[#allocation2 + $0x48] sm:$0xff] %v1205_v2  ;;  %1271 = vst [vmem:[#allocation2 + $0x58] sm:$0xff] %v1207_v3  ;;  %v874_v4 = vpop.f32.mrb[12].mxu0  ;;  %v1067_v5 = vpop.f32.mrb[12].mxu1 }
 0x202   : > { %v876_v6 = vpop.f32.mrb[13].mxu0  ;;  %v1069_v7 = vpop.f32.mrb[13].mxu1  ;;  %v875_v10 = vadd.f32 %v874_v4, %v4498_v59  ;;  %v1068_v11 = vadd.f32 %v1067_v5, %v4502_v60 }
 0x203   : > { %v878_v8 = vpop.f32.mrb[14].mxu0  ;;  %v1071_v9 = vpop.f32.mrb[14].mxu1  ;;  %v877_v16 = vadd.f32 %v876_v6, %v4506_v63  ;;  %v1070_v17 = vadd.f32 %v1069_v7, %v4510_v0 }
 0x204   : > { %v879_v12 = vadd.f32 %v878_v8, %v4498_v59  ;;  %v1072_v13 = vadd.f32 %v1071_v9, %v4502_v60  ;;  %v880_v14 = vpop.f32.mrb[15].mxu0  ;;  %v1073_v15 = vpop.f32.mrb[15].mxu1 }
 0x205   : > { %v881_v18 = vadd.f32 %v880_v14, %v4506_v63  ;;  %v1074_v19 = vadd.f32 %v1073_v15, %v4510_v0 }
 0x206   : > { %v1208_v20 = vpack.c.bf16 %v879_v12, %v875_v10  ;;  %v1210_v21 = vpack.c.bf16 %v1072_v13, %v1068_v11 }
 0x207   : > { %v1209_v22 = vpack.c.bf16 %v881_v18, %v877_v16  ;;  %v1211_v23 = vpack.c.bf16 %v1074_v19, %v1070_v17 }
 0x208   : > { %1272 = vst [vmem:[#allocation2 + $0x60] sm:$0xff] %v1208_v20  ;;  %1274 = vst [vmem:[#allocation2 + $0x70] sm:$0xff] %v1210_v21 }
 0x209   : > { %1273 = vst [vmem:[#allocation2 + $0x68] sm:$0xff] %v1209_v22  ;;  %1275 = vst [vmem:[#allocation2 + $0x78] sm:$0xff] %v1211_v23  ;;  %v884_v24 = vpop.f32.mrb[16].mxu0  ;;  %v1077_v25 = vpop.f32.mrb[16].mxu1 }
 0x20a   : > { %v886_v26 = vpop.f32.mrb[17].mxu0  ;;  %v1079_v27 = vpop.f32.mrb[17].mxu1  ;;  %v885_v30 = vadd.f32 %v884_v24, %v4498_v59  ;;  %v1078_v31 = vadd.f32 %v1077_v25, %v4502_v60 }
 0x20b   : > { %v888_v28 = vpop.f32.mrb[18].mxu0  ;;  %v1081_v29 = vpop.f32.mrb[18].mxu1  ;;  %v887_v36 = vadd.f32 %v886_v26, %v4506_v63  ;;  %v1080_v37 = vadd.f32 %v1079_v27, %v4510_v0 }
 0x20c   : > { %v889_v32 = vadd.f32 %v888_v28, %v4498_v59  ;;  %v1082_v33 = vadd.f32 %v1081_v29, %v4502_v60  ;;  %v890_v34 = vpop.f32.mrb[19].mxu0  ;;  %v1083_v35 = vpop.f32.mrb[19].mxu1 }
 0x20d   : > { %v891_v38 = vadd.f32 %v890_v34, %v4506_v63  ;;  %v1084_v39 = vadd.f32 %v1083_v35, %v4510_v0 }
 0x20e   : > { %v1212_v40 = vpack.c.bf16 %v889_v32, %v885_v30  ;;  %v1214_v41 = vpack.c.bf16 %v1082_v33, %v1078_v31 }
 0x20f   : > { %v1213_v42 = vpack.c.bf16 %v891_v38, %v887_v36  ;;  %v1215_v43 = vpack.c.bf16 %v1084_v39, %v1080_v37 }
 0x210   : > { %1276 = vst [vmem:[#allocation2 + $0x80] sm:$0xff] %v1212_v40  ;;  %1278 = vst [vmem:[#allocation2 + $0x90] sm:$0xff] %v1214_v41 }
 0x211   : > { %1277 = vst [vmem:[#allocation2 + $0x88] sm:$0xff] %v1213_v42  ;;  %1279 = vst [vmem:[#allocation2 + $0x98] sm:$0xff] %v1215_v43  ;;  %v894_v44 = vpop.f32.mrb[20].mxu0  ;;  %v1087_v45 = vpop.f32.mrb[20].mxu1 }
 0x212   : > { %v896_v46 = vpop.f32.mrb[21].mxu0  ;;  %v1089_v47 = vpop.f32.mrb[21].mxu1  ;;  %v895_v50 = vadd.f32 %v894_v44, %v4498_v59  ;;  %v1088_v51 = vadd.f32 %v1087_v45, %v4502_v60 }
 0x213   : > { %v898_v48 = vpop.f32.mrb[22].mxu0  ;;  %v1091_v49 = vpop.f32.mrb[22].mxu1  ;;  %v897_v1 = vadd.f32 %v896_v46, %v4506_v63  ;;  %v1090_v2 = vadd.f32 %v1089_v47, %v4510_v0 }
 0x214   : > { %v899_v52 = vadd.f32 %v898_v48, %v4498_v59  ;;  %v1092_v56 = vadd.f32 %v1091_v49, %v4502_v60  ;;  %v900_v61 = vpop.f32.mrb[23].mxu0  ;;  %v1093_v62 = vpop.f32.mrb[23].mxu1 }
 0x215   : > { %v901_v3 = vadd.f32 %v900_v61, %v4506_v63  ;;  %v1094_v4 = vadd.f32 %v1093_v62, %v4510_v0 }
 0x216   : > { %v1216_v5 = vpack.c.bf16 %v899_v52, %v895_v50  ;;  %v1218_v6 = vpack.c.bf16 %v1092_v56, %v1088_v51 }
 0x217   : > { %v1217_v7 = vpack.c.bf16 %v901_v3, %v897_v1  ;;  %v1219_v8 = vpack.c.bf16 %v1094_v4, %v1090_v2 }
 0x218   : > { %1280 = vst [vmem:[#allocation2 + $0xa0] sm:$0xff] %v1216_v5  ;;  %1282 = vst [vmem:[#allocation2 + $0xb0] sm:$0xff] %v1218_v6 }
 0x219   : > { %1281 = vst [vmem:[#allocation2 + $0xa8] sm:$0xff] %v1217_v7  ;;  %1283 = vst [vmem:[#allocation2 + $0xb8] sm:$0xff] %v1219_v8  ;;  %v904_v9 = vpop.f32.mrb[24].mxu0  ;;  %v1097_v10 = vpop.f32.mrb[24].mxu1 }
 0x21a   : > { %v906_v11 = vpop.f32.mrb[25].mxu0  ;;  %v1099_v12 = vpop.f32.mrb[25].mxu1  ;;  %v905_v15 = vadd.f32 %v904_v9, %v4498_v59  ;;  %v1098_v16 = vadd.f32 %v1097_v10, %v4502_v60 }
 0x21b   : > { %v908_v13 = vpop.f32.mrb[26].mxu0  ;;  %v1101_v14 = vpop.f32.mrb[26].mxu1  ;;  %v907_v21 = vadd.f32 %v906_v11, %v4506_v63  ;;  %v1100_v22 = vadd.f32 %v1099_v12, %v4510_v0 }
 0x21c   : > { %v909_v17 = vadd.f32 %v908_v13, %v4498_v59  ;;  %v1102_v18 = vadd.f32 %v1101_v14, %v4502_v60  ;;  %v910_v19 = vpop.f32.mrb[27].mxu0  ;;  %v1103_v20 = vpop.f32.mrb[27].mxu1 }
 0x21d   : > { %v911_v23 = vadd.f32 %v910_v19, %v4506_v63  ;;  %v1104_v24 = vadd.f32 %v1103_v20, %v4510_v0 }
 0x21e   : > { %v1220_v25 = vpack.c.bf16 %v909_v17, %v905_v15  ;;  %v1222_v26 = vpack.c.bf16 %v1102_v18, %v1098_v16 }
 0x21f   : > { %v1221_v27 = vpack.c.bf16 %v911_v23, %v907_v21  ;;  %v1223_v28 = vpack.c.bf16 %v1104_v24, %v1100_v22 }
 0x220   : > { %1284 = vst [vmem:[#allocation2 + $0xc0] sm:$0xff] %v1220_v25  ;;  %1286 = vst [vmem:[#allocation2 + $0xd0] sm:$0xff] %v1222_v26 }
 0x221   : > { %1285 = vst [vmem:[#allocation2 + $0xc8] sm:$0xff] %v1221_v27  ;;  %1287 = vst [vmem:[#allocation2 + $0xd8] sm:$0xff] %v1223_v28  ;;  %v914_v29 = vpop.f32.mrb[28].mxu0  ;;  %v1107_v30 = vpop.f32.mrb[28].mxu1 }
 0x222   : > { %v916_v31 = vpop.f32.mrb[29].mxu0  ;;  %v1109_v32 = vpop.f32.mrb[29].mxu1  ;;  %v915_v35 = vadd.f32 %v914_v29, %v4498_v59  ;;  %v1108_v36 = vadd.f32 %v1107_v30, %v4502_v60 }
 0x223   : > { %v918_v33 = vpop.f32.mrb[30].mxu0  ;;  %v1111_v34 = vpop.f32.mrb[30].mxu1  ;;  %v917_v41 = vadd.f32 %v916_v31, %v4506_v63  ;;  %v1110_v42 = vadd.f32 %v1109_v32, %v4510_v0 }
 0x224   : > { %v919_v37 = vadd.f32 %v918_v33, %v4498_v59  ;;  %v1112_v38 = vadd.f32 %v1111_v34, %v4502_v60  ;;  %v920_v39 = vpop.f32.mrb[31].mxu0  ;;  %v1113_v40 = vpop.f32.mrb[31].mxu1 }
 0x225   : > { %v921_v43 = vadd.f32 %v920_v39, %v4506_v63  ;;  %v1114_v44 = vadd.f32 %v1113_v40, %v4510_v0 }
 0x226   : > { %v1224_v45 = vpack.c.bf16 %v919_v37, %v915_v35  ;;  %v1226_v46 = vpack.c.bf16 %v1112_v38, %v1108_v36 }
 0x227   : > { %v1225_v47 = vpack.c.bf16 %v921_v43, %v917_v41  ;;  %v1227_v48 = vpack.c.bf16 %v1114_v44, %v1110_v42 }
 0x228   : > { %1288 = vst [vmem:[#allocation2 + $0xe0] sm:$0xff] %v1224_v45  ;;  %1290 = vst [vmem:[#allocation2 + $0xf0] sm:$0xff] %v1226_v46 }
 0x229   : > { %1289 = vst [vmem:[#allocation2 + $0xe8] sm:$0xff] %v1225_v47  ;;  %1291 = vst [vmem:[#allocation2 + $0xf8] sm:$0xff] %v1227_v48  ;;  %v924_v49 = vpop.f32.mrb[32].mxu0  ;;  %v1117_v50 = vpop.f32.mrb[32].mxu1 }
 0x22a   : > { %v926_v51 = vpop.f32.mrb[33].mxu0  ;;  %v1119_v52 = vpop.f32.mrb[33].mxu1  ;;  %v925_v62 = vadd.f32 %v924_v49, %v4498_v59  ;;  %v1118_v1 = vadd.f32 %v1117_v50, %v4502_v60 }
 0x22b   : > { %v928_v56 = vpop.f32.mrb[34].mxu0  ;;  %v1121_v61 = vpop.f32.mrb[34].mxu1  ;;  %v927_v6 = vadd.f32 %v926_v51, %v4506_v63  ;;  %v1120_v7 = vadd.f32 %v1119_v52, %v4510_v0 }
 0x22c   : > { %v929_v2 = vadd.f32 %v928_v56, %v4498_v59  ;;  %v1122_v3 = vadd.f32 %v1121_v61, %v4502_v60  ;;  %v930_v4 = vpop.f32.mrb[35].mxu0  ;;  %v1123_v5 = vpop.f32.mrb[35].mxu1 }
 0x22d   : > { %v931_v8 = vadd.f32 %v930_v4, %v4506_v63  ;;  %v1124_v9 = vadd.f32 %v1123_v5, %v4510_v0 }
 0x22e   : > { %v1228_v10 = vpack.c.bf16 %v929_v2, %v925_v62  ;;  %v1230_v11 = vpack.c.bf16 %v1122_v3, %v1118_v1 }
 0x22f   : > { %v1229_v12 = vpack.c.bf16 %v931_v8, %v927_v6  ;;  %v1231_v13 = vpack.c.bf16 %v1124_v9, %v1120_v7 }
 0x230   : > { %1292 = vst [vmem:[#allocation2 + $0x100] sm:$0xff] %v1228_v10  ;;  %1294 = vst [vmem:[#allocation2 + $0x110] sm:$0xff] %v1230_v11 }
 0x231   : > { %1293 = vst [vmem:[#allocation2 + $0x108] sm:$0xff] %v1229_v12  ;;  %1295 = vst [vmem:[#allocation2 + $0x118] sm:$0xff] %v1231_v13  ;;  %v934_v14 = vpop.f32.mrb[36].mxu0  ;;  %v1127_v15 = vpop.f32.mrb[36].mxu1 }
 0x232   : > { %v936_v16 = vpop.f32.mrb[37].mxu0  ;;  %v1129_v17 = vpop.f32.mrb[37].mxu1  ;;  %v935_v20 = vadd.f32 %v934_v14, %v4498_v59  ;;  %v1128_v21 = vadd.f32 %v1127_v15, %v4502_v60 }
 0x233   : > { %v938_v18 = vpop.f32.mrb[38].mxu0  ;;  %v1131_v19 = vpop.f32.mrb[38].mxu1  ;;  %v937_v26 = vadd.f32 %v936_v16, %v4506_v63  ;;  %v1130_v27 = vadd.f32 %v1129_v17, %v4510_v0 }
 0x234   : > { %v939_v22 = vadd.f32 %v938_v18, %v4498_v59  ;;  %v1132_v23 = vadd.f32 %v1131_v19, %v4502_v60  ;;  %v940_v24 = vpop.f32.mrb[39].mxu0  ;;  %v1133_v25 = vpop.f32.mrb[39].mxu1 }
 0x235   : > { %v941_v28 = vadd.f32 %v940_v24, %v4506_v63  ;;  %v1134_v29 = vadd.f32 %v1133_v25, %v4510_v0 }
 0x236   : > { %v1232_v30 = vpack.c.bf16 %v939_v22, %v935_v20  ;;  %v1234_v31 = vpack.c.bf16 %v1132_v23, %v1128_v21 }
 0x237   : > { %v1233_v32 = vpack.c.bf16 %v941_v28, %v937_v26  ;;  %v1235_v33 = vpack.c.bf16 %v1134_v29, %v1130_v27 }
 0x238   : > { %1296 = vst [vmem:[#allocation2 + $0x120] sm:$0xff] %v1232_v30  ;;  %1298 = vst [vmem:[#allocation2 + $0x130] sm:$0xff] %v1234_v31 }
 0x239   : > { %1297 = vst [vmem:[#allocation2 + $0x128] sm:$0xff] %v1233_v32  ;;  %1299 = vst [vmem:[#allocation2 + $0x138] sm:$0xff] %v1235_v33  ;;  %v944_v34 = vpop.f32.mrb[40].mxu0  ;;  %v1137_v35 = vpop.f32.mrb[40].mxu1 }
 0x23a   : > { %v946_v36 = vpop.f32.mrb[41].mxu0  ;;  %v1139_v37 = vpop.f32.mrb[41].mxu1  ;;  %v945_v40 = vadd.f32 %v944_v34, %v4498_v59  ;;  %v1138_v41 = vadd.f32 %v1137_v35, %v4502_v60 }
 0x23b   : > { %v948_v38 = vpop.f32.mrb[42].mxu0  ;;  %v1141_v39 = vpop.f32.mrb[42].mxu1  ;;  %v947_v46 = vadd.f32 %v946_v36, %v4506_v63  ;;  %v1140_v47 = vadd.f32 %v1139_v37, %v4510_v0 }
 0x23c   : > { %v949_v42 = vadd.f32 %v948_v38, %v4498_v59  ;;  %v1142_v43 = vadd.f32 %v1141_v39, %v4502_v60  ;;  %v950_v44 = vpop.f32.mrb[43].mxu0  ;;  %v1143_v45 = vpop.f32.mrb[43].mxu1 }
 0x23d   : > { %v951_v48 = vadd.f32 %v950_v44, %v4506_v63  ;;  %v1144_v49 = vadd.f32 %v1143_v45, %v4510_v0 }
 0x23e   : > { %v1236_v50 = vpack.c.bf16 %v949_v42, %v945_v40  ;;  %v1238_v51 = vpack.c.bf16 %v1142_v43, %v1138_v41 }
 0x23f   : > { %v1237_v52 = vpack.c.bf16 %v951_v48, %v947_v46  ;;  %v1239_v56 = vpack.c.bf16 %v1144_v49, %v1140_v47 }
 0x240   : > { %1300 = vst [vmem:[#allocation2 + $0x140] sm:$0xff] %v1236_v50  ;;  %1302 = vst [vmem:[#allocation2 + $0x150] sm:$0xff] %v1238_v51 }
 0x241   : > { %1301 = vst [vmem:[#allocation2 + $0x148] sm:$0xff] %v1237_v52  ;;  %1303 = vst [vmem:[#allocation2 + $0x158] sm:$0xff] %v1239_v56  ;;  %v954_v61 = vpop.f32.mrb[44].mxu0  ;;  %v1147_v62 = vpop.f32.mrb[44].mxu1 }
 0x242   : > { %v956_v1 = vpop.f32.mrb[45].mxu0  ;;  %v1149_v2 = vpop.f32.mrb[45].mxu1  ;;  %v955_v5 = vadd.f32 %v954_v61, %v4498_v59  ;;  %v1148_v6 = vadd.f32 %v1147_v62, %v4502_v60 }
 0x243   : > { %v958_v3 = vpop.f32.mrb[46].mxu0  ;;  %v1151_v4 = vpop.f32.mrb[46].mxu1  ;;  %v957_v11 = vadd.f32 %v956_v1, %v4506_v63  ;;  %v1150_v12 = vadd.f32 %v1149_v2, %v4510_v0 }
 0x244   : > { %v959_v7 = vadd.f32 %v958_v3, %v4498_v59  ;;  %v1152_v8 = vadd.f32 %v1151_v4, %v4502_v60  ;;  %v960_v9 = vpop.f32.mrb[47].mxu0  ;;  %v1153_v10 = vpop.f32.mrb[47].mxu1 }
 0x245   : > { %v961_v13 = vadd.f32 %v960_v9, %v4506_v63  ;;  %v1154_v14 = vadd.f32 %v1153_v10, %v4510_v0 }
 0x246   : > { %v1240_v15 = vpack.c.bf16 %v959_v7, %v955_v5  ;;  %v1242_v16 = vpack.c.bf16 %v1152_v8, %v1148_v6 }
 0x247   : > { %v1241_v17 = vpack.c.bf16 %v961_v13, %v957_v11  ;;  %v1243_v18 = vpack.c.bf16 %v1154_v14, %v1150_v12 }
 0x248   : > { %1304 = vst [vmem:[#allocation2 + $0x160] sm:$0xff] %v1240_v15  ;;  %1306 = vst [vmem:[#allocation2 + $0x170] sm:$0xff] %v1242_v16 }
 0x249   : > { %1305 = vst [vmem:[#allocation2 + $0x168] sm:$0xff] %v1241_v17  ;;  %1307 = vst [vmem:[#allocation2 + $0x178] sm:$0xff] %v1243_v18  ;;  %v964_v19 = vpop.f32.mrb[48].mxu0  ;;  %v1157_v20 = vpop.f32.mrb[48].mxu1 }
 0x24a   : > { %v966_v21 = vpop.f32.mrb[49].mxu0  ;;  %v1159_v22 = vpop.f32.mrb[49].mxu1  ;;  %v965_v25 = vadd.f32 %v964_v19, %v4498_v59  ;;  %v1158_v26 = vadd.f32 %v1157_v20, %v4502_v60 }
 0x24b   : > { %v968_v23 = vpop.f32.mrb[50].mxu0  ;;  %v1161_v24 = vpop.f32.mrb[50].mxu1  ;;  %v967_v31 = vadd.f32 %v966_v21, %v4506_v63  ;;  %v1160_v32 = vadd.f32 %v1159_v22, %v4510_v0 }
 0x24c   : > { %v969_v27 = vadd.f32 %v968_v23, %v4498_v59  ;;  %v1162_v28 = vadd.f32 %v1161_v24, %v4502_v60  ;;  %v970_v29 = vpop.f32.mrb[51].mxu0  ;;  %v1163_v30 = vpop.f32.mrb[51].mxu1 }
 0x24d   : > { %v971_v33 = vadd.f32 %v970_v29, %v4506_v63  ;;  %v1164_v34 = vadd.f32 %v1163_v30, %v4510_v0  ;;  %v1358_v30 = vld [vmem:[#allocation16] sm:$0xf] }
 0x24e   : > { %v1244_v35 = vpack.c.bf16 %v969_v27, %v965_v25  ;;  %v1246_v36 = vpack.c.bf16 %v1162_v28, %v1158_v26 }
 0x24f   : > { %v1245_v37 = vpack.c.bf16 %v971_v33, %v967_v31  ;;  %v1247_v38 = vpack.c.bf16 %v1164_v34, %v1160_v32 }
 0x250   : > { %1308 = vst [vmem:[#allocation2 + $0x180] sm:$0xff] %v1244_v35  ;;  %1310 = vst [vmem:[#allocation2 + $0x190] sm:$0xff] %v1246_v36 }
 0x251   : > { %1309 = vst [vmem:[#allocation2 + $0x188] sm:$0xff] %v1245_v37  ;;  %1311 = vst [vmem:[#allocation2 + $0x198] sm:$0xff] %v1247_v38  ;;  %v974_v39 = vpop.f32.mrb[52].mxu0  ;;  %v1167_v40 = vpop.f32.mrb[52].mxu1 }
 0x252   : > { %v976_v41 = vpop.f32.mrb[53].mxu0  ;;  %v1169_v42 = vpop.f32.mrb[53].mxu1  ;;  %v975_v45 = vadd.f32 %v974_v39, %v4498_v59  ;;  %v1168_v46 = vadd.f32 %v1167_v40, %v4502_v60 }
 0x253   : > { %v978_v43 = vpop.f32.mrb[54].mxu0  ;;  %v1171_v44 = vpop.f32.mrb[54].mxu1  ;;  %v977_v51 = vadd.f32 %v976_v41, %v4506_v63  ;;  %v1170_v52 = vadd.f32 %v1169_v42, %v4510_v0 }
 0x254   : > { %v979_v47 = vadd.f32 %v978_v43, %v4498_v59  ;;  %v1172_v48 = vadd.f32 %v1171_v44, %v4502_v60  ;;  %v980_v49 = vpop.f32.mrb[55].mxu0  ;;  %v1173_v50 = vpop.f32.mrb[55].mxu1  ;;  %v1363_v43 = vrot.slane %v1358_v30, %v536_v54 }
 0x255   : > { %v981_v56 = vadd.f32 %v980_v49, %v4506_v63  ;;  %v1174_v61 = vadd.f32 %v1173_v50, %v4510_v0 }
 0x256   : > { %v1248_v62 = vpack.c.bf16 %v979_v47, %v975_v45  ;;  %v1250_v1 = vpack.c.bf16 %v1172_v48, %v1168_v46  ;;  %v1367_v45 = vrot.slane %v1358_v30, %v540_v57  ;;  %v1375_v46 = vrot.slane %v1358_v30, %v548_v58 }
 0x257   : > { %v1249_v2 = vpack.c.bf16 %v981_v56, %v977_v51  ;;  %v1251_v3 = vpack.c.bf16 %v1174_v61, %v1170_v52 }
 0x258   : > { %1312 = vst [vmem:[#allocation2 + $0x1a0] sm:$0xff] %v1248_v62  ;;  %1314 = vst [vmem:[#allocation2 + $0x1b0] sm:$0xff] %v1250_v1 }
 0x259   : > { %1313 = vst [vmem:[#allocation2 + $0x1a8] sm:$0xff] %v1249_v2  ;;  %1315 = vst [vmem:[#allocation2 + $0x1b8] sm:$0xff] %v1251_v3  ;;  %v984_v4 = vpop.f32.mrb[56].mxu0  ;;  %v1177_v5 = vpop.f32.mrb[56].mxu1 }
 0x25a   : > { %v986_v6 = vpop.f32.mrb[57].mxu0  ;;  %v1179_v7 = vpop.f32.mrb[57].mxu1  ;;  %v985_v10 = vadd.f32 %v984_v4, %v4498_v59  ;;  %v1178_v11 = vadd.f32 %v1177_v5, %v4502_v60 }
 0x25b   : > { %v988_v8 = vpop.f32.mrb[58].mxu0  ;;  %v1181_v9 = vpop.f32.mrb[58].mxu1  ;;  %v987_v16 = vadd.f32 %v986_v6, %v4506_v63  ;;  %v1180_v17 = vadd.f32 %v1179_v7, %v4510_v0 }
 0x25c   : > { %v989_v12 = vadd.f32 %v988_v8, %v4498_v59  ;;  %v1182_v13 = vadd.f32 %v1181_v9, %v4502_v60  ;;  %v990_v14 = vpop.f32.mrb[59].mxu0  ;;  %v1183_v15 = vpop.f32.mrb[59].mxu1 }
 0x25d   : > { %v991_v18 = vadd.f32 %v990_v14, %v4506_v63  ;;  %v1184_v19 = vadd.f32 %v1183_v15, %v4510_v0 }
 0x25e   : > { %v1252_v20 = vpack.c.bf16 %v989_v12, %v985_v10  ;;  %v1254_v21 = vpack.c.bf16 %v1182_v13, %v1178_v11 }
 0x25f   : > { %v1253_v22 = vpack.c.bf16 %v991_v18, %v987_v16  ;;  %v1255_v23 = vpack.c.bf16 %v1184_v19, %v1180_v17 }
 0x260   : > { %1316 = vst [vmem:[#allocation2 + $0x1c0] sm:$0xff] %v1252_v20  ;;  %1318 = vst [vmem:[#allocation2 + $0x1d0] sm:$0xff] %v1254_v21 }
 0x261   : > { %1317 = vst [vmem:[#allocation2 + $0x1c8] sm:$0xff] %v1253_v22  ;;  %1319 = vst [vmem:[#allocation2 + $0x1d8] sm:$0xff] %v1255_v23  ;;  %v994_v24 = vpop.f32.mrb[60].mxu0  ;;  %v1187_v25 = vpop.f32.mrb[60].mxu1 }
 0x262   : > { %v996_v26 = vpop.f32.mrb[61].mxu0  ;;  %v1189_v27 = vpop.f32.mrb[61].mxu1  ;;  %v995_v31 = vadd.f32 %v994_v24, %v4498_v59  ;;  %v1188_v32 = vadd.f32 %v1187_v25, %v4502_v60 }
 0x263   : > { %v998_v28 = vpop.f32.mrb[62].mxu0  ;;  %v1191_v29 = vpop.f32.mrb[62].mxu1  ;;  %v997_v37 = vadd.f32 %v996_v26, %v4506_v63  ;;  %v1190_v38 = vadd.f32 %v1189_v27, %v4510_v0 }
 0x264   : > { %v999_v33 = vadd.f32 %v998_v28, %v4498_v59  ;;  %v1192_v34 = vadd.f32 %v1191_v29, %v4502_v60  ;;  %v1000_v35 = vpop.f32.mrb[63].mxu0  ;;  %v1193_v36 = vpop.f32.mrb[63].mxu1  ;;  %v1371_v59 = vrot.slane %v1358_v30, %v544_v55 }
 0x265   : > { %v1001_v39 = vadd.f32 %v1000_v35, %v4506_v63  ;;  %v1194_v40 = vadd.f32 %v1193_v36, %v4510_v0 }
 0x266   : > { %v1256_v41 = vpack.c.bf16 %v999_v33, %v995_v31  ;;  %v1258_v42 = vpack.c.bf16 %v1192_v34, %v1188_v32 }
 0x267   : > { %v1257_v44 = vpack.c.bf16 %v1001_v39, %v997_v37  ;;  %v1259_v60 = vpack.c.bf16 %v1194_v40, %v1190_v38 }
 0x268   : > { %1320 = vst [vmem:[#allocation2 + $0x1e0] sm:$0xff] %v1256_v41  ;;  %1322 = vst [vmem:[#allocation2 + $0x1f0] sm:$0xff] %v1258_v42 }
 0x269   : > { %1321 = vst [vmem:[#allocation2 + $0x1e8] sm:$0xff] %v1257_v44  ;;  %1323 = vst [vmem:[#allocation2 + $0x1f8] sm:$0xff] %v1259_v60  ;;  %v1574_v63 = vpop.f32.mrb[64].mxu0  ;;  %v1615_v0 = vpop.f32.mrb[64].mxu1 }
 0x26a   : > { %v1575_v47 = vadd.f32 %v1574_v63, %v1363_v43  ;;  %v1616_v48 = vadd.f32 %v1615_v0, %v1371_v59  ;;  %v1576_v54 = vpop.f32.mrb[65].mxu0  ;;  %v1617_v49 = vpop.f32.mrb[65].mxu1 }
 0x26b   : > { %v1577_v50 = vadd.f32 %v1576_v54, %v1367_v45  ;;  %v1618_v55 = vadd.f32 %v1617_v49, %v1375_v46  ;;  %v1578_v51 = vpop.f32.mrb[66].mxu0  ;;  %v1619_v52 = vpop.f32.mrb[66].mxu1 }
 0x26c   : > { %1622 = vst [vmem:[#allocation3] sm:$0xff] %v1575_v47  ;;  %1624 = vst [vmem:[#allocation3 + $0x10] sm:$0xff] %v1616_v48  ;;  %v1579_v57 = vpop.f32.mrb[67].mxu0  ;;  %v1620_v56 = vpop.f32.mrb[67].mxu1 }
 0x26d   : > { %1623 = vst [vmem:[#allocation3 + $0x8] sm:$0xff] %v1577_v50  ;;  %1625 = vst [vmem:[#allocation3 + $0x18] sm:$0xff] %v1618_v55 }
 0x26e PF: > { %p3152_p11 = scmp.le.s32.totalorder %s4122_s25, 0 }
 0x26f   : > { %v1700_v53 = vld [vmem:[#allocation2 + $0x8] sm:$0xff] (!%p3152_p11)  ;;  %v1702_v58 = vld [vmem:[#allocation2 + $0x18] sm:$0xff] (!%p3152_p11)  ;;  %v1699_v61 = vld [vmem:[#allocation2] sm:$0xff] (!%p3152_p11)  ;;  %v1630_v62 = vlaneseq (!%p3152_p11)  ;;  %s3153_s13 = sadd.s32 (!%p3152_p11), 4294967295, %s4122_s25  ;;  %v4035_v45 = vmov (!%p3152_p11), 1.0|1.0  }
 0x270   : > { %1629 = sbr.rel (%p3152_p11) target bundleno = 903 (0x387), region = 100  ;;  %1763 = vmatprep.subr.bf16.mxu0 (!%p3152_p11), %v1700_v53  ;;  %1804 = vmatprep.subr.bf16.mxu1 (!%p3152_p11), %v1702_v58  ;;  %v1701_v1 = vld [vmem:[#allocation2 + $0x10] sm:$0xff] (!%p3152_p11)  ;;  %v1704_v2 = vld [vmem:[#allocation2 + $0x28] sm:$0xff] (!%p3152_p11)  ;;  %v1706_v3 = vld [vmem:[#allocation2 + $0x38] sm:$0xff] (!%p3152_p11)  ;;  %s4650_s18 = sld [smem:[#allocation9 + %s3153_s13]] (!%p3152_p11) }
 0x271   : > { %s1641_s16 = sshra.s32 (!%p3152_p11), %s3153_s13, 7  ;;  %1764 = vmatpush1.bf16.msra.mxu0 (!%p3152_p11), %v1699_v61  ;;  %1805 = vmatpush1.bf16.msra.mxu1 (!%p3152_p11), %v1701_v1  ;;  %v4653_v4 = vshrl.u32 (!%p3152_p11), %v1630_v62, 7  ;;  %v1703_v5 = vld [vmem:[#allocation2 + $0x20] sm:$0xff] (!%p3152_p11)  ;;  %v1705_v6 = vld [vmem:[#allocation2 + $0x30] sm:$0xff] (!%p3152_p11)  ;;  %s4658_s27 = sand.u32 (!%p3152_p11), 127, %s3153_s13  ;;  %v1708_v7 = vld [vmem:[#allocation2 + $0x48] sm:$0xff] (!%p3152_p11) }
 0x272   : > { %s4655_s21 = sshll.u32 (!%p3152_p11), %s1641_s16, 7  ;;  %1765 = vmatprep.subr.bf16.mxu0 (!%p3152_p11), %v1704_v2  ;;  %1806 = vmatprep.subr.bf16.mxu1 (!%p3152_p11), %v1706_v3  ;;  %v1710_v8 = vld [vmem:[#allocation2 + $0x58] sm:$0xff] (!%p3152_p11)  ;;  %v1707_v9 = vld [vmem:[#allocation2 + $0x40] sm:$0xff] (!%p3152_p11)  ;;  %v1709_v10 = vld [vmem:[#allocation2 + $0x50] sm:$0xff] (!%p3152_p11)  ;;  %v4695_v22 = vand.u32 (!%p3152_p11), 127, %v1630_v62 }
 0x273   : > { %s3287_s24 = sadd.s32 (!%p3152_p11), 128, %s4655_s21  ;;  %s3289_s19 = sadd.s32 (!%p3152_p11), 256, %s4655_s21  ;;  %vm1635_vm0 = vcmp.eq.s32.totalorder (!%p3152_p11), %v4653_v4, 0  ;;  %v1712_v12 = vld [vmem:[#allocation2 + $0x68] sm:$0xff] (!%p3152_p11)  ;;  %v1714_v13 = vld [vmem:[#allocation2 + $0x78] sm:$0xff] (!%p3152_p11)  ;;  %vm1640_vm1 = vcmp.eq.s32.totalorder (!%p3152_p11), %v4653_v4, 1 }
 0x274   : > { %s1647_s15 = sadd.s32 (!%p3152_p11), %s3287_s24, %s4658_s27  ;;  %s1654_s20 = sadd.s32 (!%p3152_p11), %s3289_s19, %s4658_s27  ;;  %v1711_v15 = vld [vmem:[#allocation2 + $0x60] sm:$0xff] (!%p3152_p11)  ;;  %v1713_v16 = vld [vmem:[#allocation2 + $0x70] sm:$0xff] (!%p3152_p11)  ;;  %vm1651_vm2 = vcmp.eq.s32.totalorder (!%p3152_p11), %v4653_v4, 2  ;;  %v1716_v18 = vld [vmem:[#allocation2 + $0x88] sm:$0xff] (!%p3152_p11)  ;;  %vm1658_vm3 = vcmp.eq.s32.totalorder (!%p3152_p11), %v4653_v4, 3  ;;  %vm1665_vm4 = vcmp.eq.s32.totalorder (!%p3152_p11), %v4653_v4, 4 }
 0x275   : > { %s4661_s29 = sld [smem:[#allocation9 + %s1647_s15]] (!%p3152_p11)  ;;  %1766 = vmatpush1.bf16.msra.mxu0 (!%p3152_p11), %v1703_v5  ;;  %1807 = vmatpush1.bf16.msra.mxu1 (!%p3152_p11), %v1705_v6  ;;  %s3291_s26 = sadd.s32 (!%p3152_p11), 384, %s4655_s21  ;;  %v1718_v19 = vld [vmem:[#allocation2 + $0x98] sm:$0xff] (!%p3152_p11)  ;;  %v1715_v25 = vld [vmem:[#allocation2 + $0x80] sm:$0xff] (!%p3152_p11)  ;;  %v1717_v26 = vld [vmem:[#allocation2 + $0x90] sm:$0xff] (!%p3152_p11)  ;;  %vm1672_vm5 = vcmp.eq.s32.totalorder (!%p3152_p11), %v4653_v4, 5 }
 0x276   : > { %1767 = vmatprep.subr.bf16.mxu0 (!%p3152_p11), %v1708_v7  ;;  %1808 = vmatprep.subr.bf16.mxu1 (!%p3152_p11), %v1710_v8  ;;  %v1638_v11 = vstv (!%p3152_p11), %s4650_s18  ;;  %s4668_s28 = sld [smem:[#allocation9 + %s1654_s20]] (!%p3152_p11)  ;;  %s1661_s14 = sadd.s32 (!%p3152_p11), %s3291_s26, %s4658_s27  ;;  %v1720_v28 = vld [vmem:[#allocation2 + $0xa8] sm:$0xff] (!%p3152_p11)  ;;  %v1722_v29 = vld [vmem:[#allocation2 + $0xb8] sm:$0xff] (!%p3152_p11)  ;;  %vm1679_vm6 = vcmp.eq.s32.totalorder (!%p3152_p11), %v4653_v4, 6  ;;  %v1634_v33 = vadd.s32 (!%p3152_p11), 128, %v4695_v22  ;;  %vm1686_vm7 = vcmp.eq.s32.totalorder (!%p3152_p11), %v4653_v4, 7 }
 0x277   : > { %s4671_s30 = sld [smem:[#allocation9 + %s1661_s14]]  ;;  %s3293_s0 = sadd.s32 512, %s4655_s21  ;;  %v1639_v14 = vsel %vm1635_vm0, %v1638_v11, 0  ;;  %v1719_v35 = vld [vmem:[#allocation2 + $0xa0] sm:$0xff]  ;;  %v1721_v36 = vld [vmem:[#allocation2 + $0xb0] sm:$0xff]  ;;  %v1724_v38 = vld [vmem:[#allocation2 + $0xc8] sm:$0xff] }
 0x278   : > { %s1668_s13 = sadd.s32 %s3293_s0, %s4658_s27  ;;  %s3295_s16 = sadd.s32 640, %s4655_s21  ;;  %v1726_v39 = vld [vmem:[#allocation2 + $0xd8] sm:$0xff]  ;;  %v1723_v43 = vld [vmem:[#allocation2 + $0xc0] sm:$0xff]  ;;  %v1725_v59 = vld [vmem:[#allocation2 + $0xd0] sm:$0xff] }
 0x279   : > { %1768 = vmatpush1.bf16.msra.mxu0 %v1707_v9  ;;  %1809 = vmatpush1.bf16.msra.mxu1 %v1709_v10  ;;  %s4677_s18 = sld [smem:[#allocation9 + %s1668_s13]]  ;;  %s1675_s24 = sadd.s32 %s3295_s16, %s4658_s27  ;;  %v1728_v44 = vld [vmem:[#allocation2 + $0xe8] sm:$0xff]  ;;  %v1730_v60 = vld [vmem:[#allocation2 + $0xf8] sm:$0xff]  ;;  %v1727_v46 = vld [vmem:[#allocation2 + $0xe0] sm:$0xff] }
 0x27a   : > { %1769 = vmatprep.subr.bf16.mxu0 %v1712_v12  ;;  %1810 = vmatprep.subr.bf16.mxu1 %v1714_v13  ;;  %s4682_s15 = sld [smem:[#allocation9 + %s1675_s24]]  ;;  %s3297_s19 = sadd.s32 768, %s4655_s21  ;;  %v1729_v63 = vld [vmem:[#allocation2 + $0xf0] sm:$0xff]  ;;  %v1732_v0 = vld [vmem:[#allocation2 + $0x108] sm:$0xff]  ;;  %v1734_v47 = vld [vmem:[#allocation2 + $0x118] sm:$0xff] }
 0x27b   : > { %v1649_v17 = vstv %s4661_s29  ;;  %s1682_s20 = sadd.s32 %s3297_s19, %s4658_s27  ;;  %s3299_s26 = sadd.s32 896, %s4655_s21  ;;  %v1731_v48 = vld [vmem:[#allocation2 + $0x100] sm:$0xff]  ;;  %v1733_v54 = vld [vmem:[#allocation2 + $0x110] sm:$0xff]  ;;  %v1736_v49 = vld [vmem:[#allocation2 + $0x128] sm:$0xff] }
 0x27c   : > { %v1650_v20 = vsel %vm1640_vm1, %v1649_v17, %v1639_v14  ;;  %v1656_v21 = vstv %s4668_s28  ;;  %s4691_s14 = sld [smem:[#allocation9 + %s1682_s20]]  ;;  %s1689_s0 = sadd.s32 %s3299_s26, %s4658_s27  ;;  %v1738_v50 = vld [vmem:[#allocation2 + $0x138] sm:$0xff]  ;;  %v1735_v55 = vld [vmem:[#allocation2 + $0x120] sm:$0xff]  ;;  %v1737_v51 = vld [vmem:[#allocation2 + $0x130] sm:$0xff] }
 0x27d   : > { %1770 = vmatpush1.bf16.msra.mxu0 %v1711_v15  ;;  %1811 = vmatpush1.bf16.msra.mxu1 %v1713_v16  ;;  %v1657_v23 = vsel %vm1651_vm2, %v1656_v21, %v1650_v20  ;;  %v1663_v24 = vstv %s4671_s30  ;;  %s1690_s29 = sld [smem:[#allocation9 + %s1689_s0]]  ;;  %v1740_v52 = vld [vmem:[#allocation2 + $0x148] sm:$0xff]  ;;  %v1742_v57 = vld [vmem:[#allocation2 + $0x158] sm:$0xff]  ;;  %v1739_v56 = vld [vmem:[#allocation2 + $0x140] sm:$0xff] }
 0x27e   : > { %1771 = vmatprep.subr.bf16.mxu0 %v1716_v18  ;;  %1812 = vmatprep.subr.bf16.mxu1 %v1718_v19  ;;  %v1664_v27 = vsel %vm1658_vm3, %v1663_v24, %v1657_v23  ;;  %v1741_v53 = vld [vmem:[#allocation2 + $0x150] sm:$0xff]  ;;  %v1744_v58 = vld [vmem:[#allocation2 + $0x168] sm:$0xff]  ;;  %v1746_v61 = vld [vmem:[#allocation2 + $0x178] sm:$0xff] }
 0x27f   : > { %v1670_v30 = vstv %s4677_s18  ;;  %v1743_v62 = vld [vmem:[#allocation2 + $0x160] sm:$0xff]  ;;  %v1745_v1 = vld [vmem:[#allocation2 + $0x170] sm:$0xff]  ;;  %v1748_v2 = vld [vmem:[#allocation2 + $0x188] sm:$0xff] }
 0x280   : > { %v1671_v31 = vsel %vm1665_vm4, %v1670_v30, %v1664_v27  ;;  %v1677_v32 = vstv %s4682_s15  ;;  %v1750_v3 = vld [vmem:[#allocation2 + $0x198] sm:$0xff]  ;;  %v1747_v4 = vld [vmem:[#allocation2 + $0x180] sm:$0xff]  ;;  %v1749_v5 = vld [vmem:[#allocation2 + $0x190] sm:$0xff] }
 0x281   : > { %1772 = vmatpush1.bf16.msra.mxu0 %v1715_v25  ;;  %1813 = vmatpush1.bf16.msra.mxu1 %v1717_v26  ;;  %v1678_v34 = vsel %vm1672_vm5, %v1677_v32, %v1671_v31  ;;  %v1752_v6 = vld [vmem:[#allocation2 + $0x1a8] sm:$0xff]  ;;  %v1754_v7 = vld [vmem:[#allocation2 + $0x1b8] sm:$0xff]  ;;  %v1751_v8 = vld [vmem:[#allocation2 + $0x1a0] sm:$0xff] }
 0x282   : > { %1773 = vmatprep.subr.bf16.mxu0 %v1720_v28  ;;  %1814 = vmatprep.subr.bf16.mxu1 %v1722_v29  ;;  %v1684_v37 = vstv %s4691_s14  ;;  %v1753_v9 = vld [vmem:[#allocation2 + $0x1b0] sm:$0xff]  ;;  %v1756_v10 = vld [vmem:[#allocation2 + $0x1c8] sm:$0xff]  ;;  %v1758_v11 = vld [vmem:[#allocation2 + $0x1d8] sm:$0xff] }
 0x283   : > { %v1685_v40 = vsel %vm1679_vm6, %v1684_v37, %v1678_v34  ;;  %v1691_v41 = vstv %s1690_s29  ;;  %v1755_v12 = vld [vmem:[#allocation2 + $0x1c0] sm:$0xff]  ;;  %v1757_v13 = vld [vmem:[#allocation2 + $0x1d0] sm:$0xff]  ;;  %v1760_v14 = vld [vmem:[#allocation2 + $0x1e8] sm:$0xff] }
 0x284   : > { %v4708_v42 = vsel %vm1686_vm7, %v1691_v41, %v1685_v40  ;;  %v1762_v15 = vld [vmem:[#allocation2 + $0x1f8] sm:$0xff]  ;;  %v1759_v16 = vld [vmem:[#allocation2 + $0x1e0] sm:$0xff]  ;;  %v1761_v17 = vld [vmem:[#allocation2 + $0x1f0] sm:$0xff] }
 0x285   : > { %1774 = vmatpush1.bf16.msra.mxu0 %v1719_v35  ;;  %1815 = vmatpush1.bf16.msra.mxu1 %v1721_v36  ;;  %vm1694_vm8 = vcmp.eq.s32.totalorder %v1634_v33, %v4708_v42  ;;  %vm1693_vm10 = vcmp.eq.s32.totalorder %v4695_v22, %v4708_v42 }
 0x286   : > { %1775 = vmatprep.subr.bf16.mxu0 %v1724_v38  ;;  %1816 = vmatprep.subr.bf16.mxu1 %v1726_v39  ;;  %vm3161_vm9 = vmpackc.low %vm1694_vm8, %vm1694_vm8 }
 0x287   : > { %3162 = vmatprep.mubr.msk.bf16.mxu0 %vm3161_vm9, %v4035_v45  ;;  %3166 = vmatprep.mubr.msk.bf16.mxu1 %vm3161_vm9, %v4035_v45  ;;  %vm3163_vm11 = vmpackc.low %vm1693_vm10, %vm1693_vm10 }
 0x289   : > { %1776 = vmatpush1.bf16.msra.mxu0 %v1723_v43  ;;  %1817 = vmatpush1.bf16.msra.mxu1 %v1725_v59 }
 0x28a   : > { %1777 = vmatprep.subr.bf16.mxu0 %v1728_v44  ;;  %1818 = vmatprep.subr.bf16.mxu1 %v1730_v60 }
 0x28d   : > { %1778 = vmatpush1.bf16.msra.mxu0 %v1727_v46  ;;  %1819 = vmatpush1.bf16.msra.mxu1 %v1729_v63 }
 0x28e   : > { %1779 = vmatprep.subr.bf16.mxu0 %v1732_v0  ;;  %1820 = vmatprep.subr.bf16.mxu1 %v1734_v47 }
 0x291   : > { %1780 = vmatpush1.bf16.msra.mxu0 %v1731_v48  ;;  %1821 = vmatpush1.bf16.msra.mxu1 %v1733_v54 }
 0x292   : > { %1781 = vmatprep.subr.bf16.mxu0 %v1736_v49  ;;  %1822 = vmatprep.subr.bf16.mxu1 %v1738_v50 }
 0x295   : > { %1782 = vmatpush1.bf16.msra.mxu0 %v1735_v55  ;;  %1823 = vmatpush1.bf16.msra.mxu1 %v1737_v51 }
 0x296   : > { %1783 = vmatprep.subr.bf16.mxu0 %v1740_v52  ;;  %1824 = vmatprep.subr.bf16.mxu1 %v1742_v57 }
 0x299   : > { %1784 = vmatpush1.bf16.msra.mxu0 %v1739_v56  ;;  %1825 = vmatpush1.bf16.msra.mxu1 %v1741_v53 }
 0x29a   : > { %1785 = vmatprep.subr.bf16.mxu0 %v1744_v58  ;;  %1826 = vmatprep.subr.bf16.mxu1 %v1746_v61 }
 0x29d   : > { %1786 = vmatpush1.bf16.msra.mxu0 %v1743_v62  ;;  %1827 = vmatpush1.bf16.msra.mxu1 %v1745_v1 }
 0x29e   : > { %1787 = vmatprep.subr.bf16.mxu0 %v1748_v2  ;;  %1828 = vmatprep.subr.bf16.mxu1 %v1750_v3 }
 0x2a1   : > { %1788 = vmatpush1.bf16.msra.mxu0 %v1747_v4  ;;  %1829 = vmatpush1.bf16.msra.mxu1 %v1749_v5 }
 0x2a2   : > { %1789 = vmatprep.subr.bf16.mxu0 %v1752_v6  ;;  %1830 = vmatprep.subr.bf16.mxu1 %v1754_v7 }
 0x2a5   : > { %1790 = vmatpush1.bf16.msra.mxu0 %v1751_v8  ;;  %1831 = vmatpush1.bf16.msra.mxu1 %v1753_v9 }
 0x2a6   : > { %1791 = vmatprep.subr.bf16.mxu0 %v1756_v10  ;;  %1832 = vmatprep.subr.bf16.mxu1 %v1758_v11 }
 0x2a9   : > { %1792 = vmatpush1.bf16.msra.mxu0 %v1755_v12  ;;  %1833 = vmatpush1.bf16.msra.mxu1 %v1757_v13 }
 0x2aa   : > { %1793 = vmatprep.subr.bf16.mxu0 %v1760_v14  ;;  %1834 = vmatprep.subr.bf16.mxu1 %v1762_v15 }
 0x2ad   : > { %1794 = vmatpush1.bf16.msra.mxu0 %v1759_v16  ;;  %1835 = vmatpush1.bf16.msra.mxu1 %v1761_v17 }
 0x2b0   : > { %3164 = vmatmul.mubr.msk.bf16.vlgmr.msra.gmra.mrb[0].mxu0 %vm3163_vm11, %v4035_v45  ;;  %3168 = vmatmul.mubr.msk.bf16.vlgmr.msra.gmra.mrb[0].mxu1 %vm3163_vm11, %v4035_v45 }
 0x383   : > { %v1797_v18 = vpop.f32.mrb[0].mxu0  ;;  %v1838_v19 = vpop.f32.mrb[0].mxu1 }
 0x384   : > { %1845 = vst [vmem:[#allocation3] sm:$0xff] %v1797_v18  ;;  %1847 = vst [vmem:[#allocation3 + $0x10] sm:$0xff] %v1838_v19  ;;  %v1799_v20 = vpop.f32.mrb[1].mxu0  ;;  %v1840_v21 = vpop.f32.mrb[1].mxu1 }
 0x385   : > { %1846 = vst [vmem:[#allocation3 + $0x8] sm:$0xff] %v1799_v20  ;;  %1848 = vst [vmem:[#allocation3 + $0x18] sm:$0xff] %v1840_v21  ;;  %v1801_v23 = vpop.f32.mrb[2].mxu0  ;;  %v1842_v24 = vpop.f32.mrb[2].mxu1 }
 0x386   : > { %v1802_v25 = vpop.f32.mrb[3].mxu0  ;;  %v1843_v26 = vpop.f32.mrb[3].mxu1 }
 0x387 PF: > { %v3496_v22 = vld [vmem:[#allocation15 + $0x4] ss:$16 sps:$4 sm:$0xff]   ;;  %v3498_v27 = vld [vmem:[#allocation15] ss:$16 sps:$4 sm:$0xff]   ;;  %v4036_v28 = vmov 0   ;;  %s3300_s28 = sshll.u32 %s4122_s25, 8 }
 0x388   : > { %2079 = vmatprep.mubr.bf16.mxu0 %v4036_v28  ;;  %2120 = vmatprep.mubr.bf16.mxu1 %v4036_v28  ;;  %v3499_v29 = vld [vmem:[#allocation15 + $0x24] ss:$16 sps:$4 sm:$0xff]   ;;  %v3501_v30 = vld [vmem:[#allocation15 + $0x20] ss:$16 sps:$4 sm:$0xff]   ;;  %v3507_v32 = vld [vmem:[#allocation15 + $0xc] ss:$16 sps:$4 sm:$0xff]   ;;  %s4738_s18 = scalar_lea.hbm %s4795_s11, %s3300_s28 }
 0x389   : > { %2047 = vmatprep.subr.bf16.mxu0 %v3496_v22  ;;  %v3502_v31 = vld [vmem:[#allocation15 + $0x44] ss:$16 sps:$4 sm:$0xff]   ;;  %v3510_v33 = vld [vmem:[#allocation15 + $0x8] ss:$16 sps:$4 sm:$0xff]   ;;  %v3504_v34 = vld [vmem:[#allocation15 + $0x40] ss:$16 sps:$4 sm:$0xff]   ;;  %2088 = vmatprep.subr.bf16.mxu1 %v3507_v32 }
 0x38a   : > { %2048 = vmatpush1.bf16.msra.mxu0 %v3498_v27  ;;  %v3505_v35 = vld [vmem:[#allocation15 + $0x64] ss:$16 sps:$4 sm:$0xff]   ;;  %2089 = vmatpush1.bf16.msra.mxu1 %v3510_v33  ;;  %v3513_v36 = vld [vmem:[#allocation15 + $0x2c] ss:$16 sps:$4 sm:$0xff]   ;;  %v3516_v37 = vld [vmem:[#allocation15 + $0x28] ss:$16 sps:$4 sm:$0xff]  }
 0x38b   : > { %2049 = vmatprep.subr.bf16.mxu0 %v3499_v29  ;;  %2090 = vmatprep.subr.bf16.mxu1 %v3513_v36  ;;  %v3509_v38 = vld [vmem:[#allocation15 + $0x60] ss:$16 sps:$4 sm:$0xff]   ;;  %v3511_v39 = vld [vmem:[#allocation15 + $0x84] ss:$16 sps:$4 sm:$0xff]   ;;  %v3519_v40 = vld [vmem:[#allocation15 + $0x4c] ss:$16 sps:$4 sm:$0xff]  }
 0x38c   : > { %v3522_v41 = vld [vmem:[#allocation15 + $0x48] ss:$16 sps:$4 sm:$0xff]   ;;  %v3525_v42 = vld [vmem:[#allocation15 + $0x6c] ss:$16 sps:$4 sm:$0xff]   ;;  %v3515_v43 = vld [vmem:[#allocation15 + $0x80] ss:$16 sps:$4 sm:$0xff]  }
 0x38d   : > { %v3517_v59 = vld [vmem:[#allocation15 + $0xa4] ss:$16 sps:$4 sm:$0xff]   ;;  %v3528_v44 = vld [vmem:[#allocation15 + $0x68] ss:$16 sps:$4 sm:$0xff]   ;;  %v3531_v60 = vld [vmem:[#allocation15 + $0x8c] ss:$16 sps:$4 sm:$0xff]  }
 0x38e   : > { %2050 = vmatpush1.bf16.msra.mxu0 %v3501_v30  ;;  %2091 = vmatpush1.bf16.msra.mxu1 %v3516_v37  ;;  %v3521_v45 = vld [vmem:[#allocation15 + $0xa0] ss:$16 sps:$4 sm:$0xff]   ;;  %v3523_v46 = vld [vmem:[#allocation15 + $0xc4] ss:$16 sps:$4 sm:$0xff]   ;;  %v3534_v63 = vld [vmem:[#allocation15 + $0x88] ss:$16 sps:$4 sm:$0xff]  }
 0x38f   : > { %2051 = vmatprep.subr.bf16.mxu0 %v3502_v31  ;;  %2092 = vmatprep.subr.bf16.mxu1 %v3519_v40  ;;  %v3535_v0 = vld [vmem:[#allocation15 + $0xac] ss:$16 sps:$4 sm:$0xff]   ;;  %v3527_v47 = vld [vmem:[#allocation15 + $0xc0] ss:$16 sps:$4 sm:$0xff]   ;;  %v3529_v48 = vld [vmem:[#allocation15 + $0xe4] ss:$16 sps:$4 sm:$0xff]  }
 0x390   : > { %v3537_v54 = vld [vmem:[#allocation15 + $0xa8] ss:$16 sps:$4 sm:$0xff]   ;;  %v3538_v49 = vld [vmem:[#allocation15 + $0xcc] ss:$16 sps:$4 sm:$0xff]   ;;  %v3533_v50 = vld [vmem:[#allocation15 + $0xe0] ss:$16 sps:$4 sm:$0xff]  }
 0x391   : > { %v1853_v55 = vld [vmem:[#allocation4] sm:$0xff]  ;;  %v3540_v51 = vld [vmem:[#allocation15 + $0xc8] ss:$16 sps:$4 sm:$0xff]   ;;  %v3541_v57 = vld [vmem:[#allocation15 + $0xec] ss:$16 sps:$4 sm:$0xff]   ;;  %s2925_s30 = sshll.u32 %s4381_s17, 4  ;;  %s4740_s30 = int_to_ptr.vmem [resolvable:$true] %s2925_s30 }
 0x392   : > { %2052 = vmatpush1.bf16.msra.mxu0 %v3504_v34  ;;  %2093 = vmatpush1.bf16.msra.mxu1 %v3522_v41  ;;  %v3546_v52 = vld [vmem:[#allocation19 + $0x4] ss:$16 sps:$4 sm:$0xff]   ;;  %v1854_v56 = vpack.c.bf16 %v1853_v55, %v1853_v55  ;;  %v3544_v58 = vld [vmem:[#allocation19] ss:$16 sps:$4 sm:$0xff]   ;;  %v3549_v61 = vld [vmem:[#allocation19 + $0xc] ss:$16 sps:$4 sm:$0xff]  }
 0x393   : > { %2053 = vmatprep.subr.bf16.mxu0 %v3505_v35  ;;  %2094 = vmatprep.subr.bf16.mxu1 %v3525_v42  ;;  %v3543_v53 = vld [vmem:[#allocation15 + $0xe8] ss:$16 sps:$4 sm:$0xff]   ;;  %v3550_v1 = vld [vmem:[#allocation19 + $0x20] ss:$16 sps:$4 sm:$0xff]   ;;  %v3547_v2 = vld [vmem:[#allocation19 + $0x8] ss:$16 sps:$4 sm:$0xff]  }
 0x394   : > { %v3552_v62 = vld [vmem:[#allocation19 + $0x24] ss:$16 sps:$4 sm:$0xff]   ;;  %v3555_v4 = vld [vmem:[#allocation19 + $0x2c] ss:$16 sps:$4 sm:$0xff]   ;;  %v3556_v5 = vld [vmem:[#allocation19 + $0x40] ss:$16 sps:$4 sm:$0xff]  }
 0x395   : > { %v3558_v3 = vld [vmem:[#allocation19 + $0x44] ss:$16 sps:$4 sm:$0xff]   ;;  %v3553_v6 = vld [vmem:[#allocation19 + $0x28] ss:$16 sps:$4 sm:$0xff]   ;;  %v3561_v8 = vld [vmem:[#allocation19 + $0x4c] ss:$16 sps:$4 sm:$0xff]  }
 0x396   : > { %2054 = vmatpush1.bf16.msra.mxu0 %v3509_v38  ;;  %2095 = vmatpush1.bf16.msra.mxu1 %v3528_v44  ;;  %v3564_v7 = vld [vmem:[#allocation19 + $0x64] ss:$16 sps:$4 sm:$0xff]   ;;  %v3562_v9 = vld [vmem:[#allocation19 + $0x60] ss:$16 sps:$4 sm:$0xff]   ;;  %v3559_v10 = vld [vmem:[#allocation19 + $0x48] ss:$16 sps:$4 sm:$0xff]  }
 0x397   : > { %2055 = vmatprep.subr.bf16.mxu0 %v3511_v39  ;;  %2096 = vmatprep.subr.bf16.mxu1 %v3531_v60  ;;  %v3567_v11 = vld [vmem:[#allocation19 + $0x6c] ss:$16 sps:$4 sm:$0xff]   ;;  %v3565_v12 = vld [vmem:[#allocation19 + $0x68] ss:$16 sps:$4 sm:$0xff]   ;;  %v3570_v13 = vld [vmem:[#allocation19 + $0x84] ss:$16 sps:$4 sm:$0xff]  }
 0x398   : > { %v3568_v14 = vld [vmem:[#allocation19 + $0x80] ss:$16 sps:$4 sm:$0xff]   ;;  %v3573_v15 = vld [vmem:[#allocation19 + $0x8c] ss:$16 sps:$4 sm:$0xff]   ;;  %v3571_v16 = vld [vmem:[#allocation19 + $0x88] ss:$16 sps:$4 sm:$0xff]  }
 0x399   : > { %v3576_v17 = vld [vmem:[#allocation19 + $0xa4] ss:$16 sps:$4 sm:$0xff]   ;;  %v3574_v18 = vld [vmem:[#allocation19 + $0xa0] ss:$16 sps:$4 sm:$0xff]   ;;  %v3579_v19 = vld [vmem:[#allocation19 + $0xac] ss:$16 sps:$4 sm:$0xff]  }
 0x39a   : > { %2056 = vmatpush1.bf16.msra.mxu0 %v3515_v43  ;;  %2097 = vmatpush1.bf16.msra.mxu1 %v3534_v63  ;;  %v3577_v20 = vld [vmem:[#allocation19 + $0xa8] ss:$16 sps:$4 sm:$0xff]   ;;  %v3582_v21 = vld [vmem:[#allocation19 + $0xc4] ss:$16 sps:$4 sm:$0xff]   ;;  %v3580_v23 = vld [vmem:[#allocation19 + $0xc0] ss:$16 sps:$4 sm:$0xff]  }
 0x39b   : > { %2057 = vmatprep.subr.bf16.mxu0 %v3517_v59  ;;  %2098 = vmatprep.subr.bf16.mxu1 %v3535_v0  ;;  %v3585_v24 = vld [vmem:[#allocation19 + $0xcc] ss:$16 sps:$4 sm:$0xff]   ;;  %v3583_v25 = vld [vmem:[#allocation19 + $0xc8] ss:$16 sps:$4 sm:$0xff]   ;;  %v3588_v26 = vld [vmem:[#allocation19 + $0xe4] ss:$16 sps:$4 sm:$0xff]  }
 0x39c   : > { %v3586_v22 = vld [vmem:[#allocation19 + $0xe0] ss:$16 sps:$4 sm:$0xff]   ;;  %v3591_v27 = vld [vmem:[#allocation19 + $0xec] ss:$16 sps:$4 sm:$0xff]   ;;  %v3589_v29 = vld [vmem:[#allocation19 + $0xe8] ss:$16 sps:$4 sm:$0xff]  }
 0x39d   : > { %v2190_v30 = vld [vmem:[#allocation6] sm:$0xff]  ;;  %v3594_v32 = vld [vmem:[#allocation18 + $0x4] ss:$16 sps:$4 sm:$0xff]   ;;  %v3595_v35 = vld [vmem:[#allocation18 + $0x8] ss:$16 sps:$4 sm:$0xff]   ;;  %s2911_s25 = scalar_lea.sflag [#allocation12], %s455_s23 }
 0x39e   : > { %2058 = vmatpush1.bf16.msra.mxu0 %v3521_v45  ;;  %2099 = vmatpush1.bf16.msra.mxu1 %v3537_v54  ;;  %v2191_v31 = vpack.c.bf16 %v2190_v30, %v2190_v30  ;;  %v3597_v33 = vld [vmem:[#allocation18 + $0xc] ss:$16 sps:$4 sm:$0xff]   ;;  %v3592_v34 = vld [vmem:[#allocation18] ss:$16 sps:$4 sm:$0xff]   ;;  %v3600_v36 = vld [vmem:[#allocation18 + $0x24] ss:$16 sps:$4 sm:$0xff]  }
 0x39f   : > { %2059 = vmatprep.subr.bf16.mxu0 %v3523_v46  ;;  %2100 = vmatprep.subr.bf16.mxu1 %v3538_v49  ;;  %v3603_v37 = vld [vmem:[#allocation18 + $0x2c] ss:$16 sps:$4 sm:$0xff]   ;;  %v3598_v38 = vld [vmem:[#allocation18 + $0x20] ss:$16 sps:$4 sm:$0xff]   ;;  %v3601_v39 = vld [vmem:[#allocation18 + $0x28] ss:$16 sps:$4 sm:$0xff]  }
 0x3a0   : > { %v3606_v40 = vld [vmem:[#allocation18 + $0x44] ss:$16 sps:$4 sm:$0xff]   ;;  %v3609_v41 = vld [vmem:[#allocation18 + $0x4c] ss:$16 sps:$4 sm:$0xff]   ;;  %v3604_v42 = vld [vmem:[#allocation18 + $0x40] ss:$16 sps:$4 sm:$0xff]  }
 0x3a1   : > { %v3607_v43 = vld [vmem:[#allocation18 + $0x48] ss:$16 sps:$4 sm:$0xff]   ;;  %v3612_v59 = vld [vmem:[#allocation18 + $0x64] ss:$16 sps:$4 sm:$0xff]   ;;  %v3615_v44 = vld [vmem:[#allocation18 + $0x6c] ss:$16 sps:$4 sm:$0xff]  }
 0x3a2   : > { %2060 = vmatpush1.bf16.msra.mxu0 %v3527_v47  ;;  %2101 = vmatpush1.bf16.msra.mxu1 %v3540_v51  ;;  %v3610_v60 = vld [vmem:[#allocation18 + $0x60] ss:$16 sps:$4 sm:$0xff]   ;;  %v3613_v45 = vld [vmem:[#allocation18 + $0x68] ss:$16 sps:$4 sm:$0xff]   ;;  %v3618_v46 = vld [vmem:[#allocation18 + $0x84] ss:$16 sps:$4 sm:$0xff]  }
 0x3a3   : > { %2061 = vmatprep.subr.bf16.mxu0 %v3529_v48  ;;  %2102 = vmatprep.subr.bf16.mxu1 %v3541_v57  ;;  %v3621_v63 = vld [vmem:[#allocation18 + $0x8c] ss:$16 sps:$4 sm:$0xff]   ;;  %v3616_v0 = vld [vmem:[#allocation18 + $0x80] ss:$16 sps:$4 sm:$0xff]   ;;  %v3619_v47 = vld [vmem:[#allocation18 + $0x88] ss:$16 sps:$4 sm:$0xff]  }
 0x3a4   : > { %v3622_v48 = vld [vmem:[#allocation18 + $0xa0] ss:$16 sps:$4 sm:$0xff]   ;;  %v3624_v54 = vld [vmem:[#allocation18 + $0xa4] ss:$16 sps:$4 sm:$0xff]   ;;  %v3625_v49 = vld [vmem:[#allocation18 + $0xa8] ss:$16 sps:$4 sm:$0xff]  }
 0x3a5   : > { %v3630_v55 = vld [vmem:[#allocation18 + $0xc4] ss:$16 sps:$4 sm:$0xff]   ;;  %v3633_v51 = vld [vmem:[#allocation18 + $0xcc] ss:$16 sps:$4 sm:$0xff]   ;;  %v3631_v57 = vld [vmem:[#allocation18 + $0xc8] ss:$16 sps:$4 sm:$0xff]  }
 0x3a6   : > { %2062 = vmatpush1.bf16.msra.mxu0 %v3533_v50  ;;  %2103 = vmatpush1.bf16.msra.mxu1 %v3543_v53  ;;  %v3627_v50 = vld [vmem:[#allocation18 + $0xac] ss:$16 sps:$4 sm:$0xff]   ;;  %s3932_s24 = scalar_lea.vmem %s4740_s30, 256  ;;  %p4834_p10 = scmp.ne.s32.totalorder %s4814_s12, 0 }
 0x3a7   : > { %2384 = vmatprep.subr.bf16.mxu0 %v3546_v52  ;;  %2425 = vmatprep.subr.bf16.mxu1 %v3549_v61  ;;  %v3628_v52 = vld [vmem:[#allocation18 + $0xc0] ss:$16 sps:$4 sm:$0xff]   ;;  %v3639_v53 = vld [vmem:[#allocation18 + $0xec] ss:$16 sps:$4 sm:$0xff]   ;;  %v3637_v61 = vld [vmem:[#allocation18 + $0xe8] ss:$16 sps:$4 sm:$0xff]   ;;  %p3933_p0 = scmp.ne.s32.totalorder %s4740_s30, %s3932_s24 }
 0x3a8   : > { %s4037_s15 = smov [#allocation24]  }
 0x3a9   : > { %2080 = vmatmul.mubr.bf16.vlgmr.msra.gmra.mrb[0].mxu0 %v1854_v56  ;;  %2121 = vmatmul.mubr.bf16.vlgmr.msra.gmra.mrb[0].mxu1 %v1854_v56  ;;  %v3636_v56 = vld [vmem:[#allocation18 + $0xe4] ss:$16 sps:$4 sm:$0xff]   ;;  %p3934_p6 = pnand %p3933_p0, %p4834_p10  ;;  %s3936_s19 = sshll.u32 %s4037_s15, 4  ;;  %s3937_s19 = int_to_ptr.vmem [resolvable:$false] %s3936_s19 }
 0x3aa   : > { %2385 = vmatpush1.bf16.msra.mxu0 %v3544_v58  ;;  %2416 = vmatprep.mubr.bf16.mxu0 %v4036_v28  ;;  %v3634_v58 = vld [vmem:[#allocation18 + $0xe0] ss:$16 sps:$4 sm:$0xff]   ;;  %s3938_s20 = scalar_lea.vmem %s3937_s19, 512  ;;  %p3939_p1 = scmp.lt.s32.totalorder %s4740_s30, %s3937_s19 }
 0x3ab   : > { %2386 = vmatprep.subr.bf16.mxu0 %v3552_v62  ;;  %2426 = vmatpush1.bf16.msra.mxu1 %v3547_v2  ;;  %v1849_v62 = vld [vmem:[#allocation3] sm:$0xff]  ;;  %p3935_p2 = pneg %p3934_p6  ;;  %p3940_p8 = scmp.lt.s32.totalorder %s3938_s20, %s3932_s24 }
 0x3ac   : > { %2427 = vmatprep.subr.bf16.mxu1 %v3555_v4  ;;  %2457 = vmatprep.mubr.bf16.mxu1 %v4036_v28 }
 0x3ad   : > { %p3941_p9 = por %p3940_p8, %p3939_p1 }
 0x3ae   : > { %2387 = vmatpush1.bf16.msra.mxu0 %v3550_v1  ;;  %v1850_v1 = vld [vmem:[#allocation3 + $0x8] sm:$0xff] }
 0x3af   : > { %2388 = vmatprep.subr.bf16.mxu0 %v3558_v3  ;;  %2428 = vmatpush1.bf16.msra.mxu1 %v3553_v6  ;;  %p3942_p4 = pnand %p3941_p9, %p3935_p2 }
 0x3b0   : > { %2429 = vmatprep.subr.bf16.mxu1 %v3561_v8 }
 0x3b2   : > { %2389 = vmatpush1.bf16.msra.mxu0 %v3556_v5 }
 0x3b3   : > { %2390 = vmatprep.subr.bf16.mxu0 %v3564_v7  ;;  %2430 = vmatpush1.bf16.msra.mxu1 %v3559_v10  ;;  %v1852_v10 = vld [vmem:[#allocation3 + $0x18] sm:$0xff] }
 0x3b4   : > { %2431 = vmatprep.subr.bf16.mxu1 %v3567_v11 }
 0x3b6   : > { %2391 = vmatpush1.bf16.msra.mxu0 %v3562_v9 }
 0x3b7   : > { %2432 = vmatpush1.bf16.msra.mxu1 %v3565_v12  ;;  %2392 = vmatprep.subr.bf16.mxu0 %v3570_v13 }
 0x3b8   : > { %2433 = vmatprep.subr.bf16.mxu1 %v3573_v15 }
 0x3ba   : > { %2393 = vmatpush1.bf16.msra.mxu0 %v3568_v14 }
 0x3bb   : > { %2434 = vmatpush1.bf16.msra.mxu1 %v3571_v16  ;;  %2394 = vmatprep.subr.bf16.mxu0 %v3576_v17 }
 0x3bc   : > { %2435 = vmatprep.subr.bf16.mxu1 %v3579_v19  ;;  %v1851_v19 = vld [vmem:[#allocation3 + $0x10] sm:$0xff] }
 0x3be   : > { %2395 = vmatpush1.bf16.msra.mxu0 %v3574_v18 }
 0x3bf   : > { %2436 = vmatpush1.bf16.msra.mxu1 %v3577_v20  ;;  %2396 = vmatprep.subr.bf16.mxu0 %v3582_v21 }
 0x3c0   : > { %2437 = vmatprep.subr.bf16.mxu1 %v3585_v24 }
 0x3c2   : > { %2397 = vmatpush1.bf16.msra.mxu0 %v3580_v23 }
 0x3c3   : > { %2438 = vmatpush1.bf16.msra.mxu1 %v3583_v25  ;;  %2398 = vmatprep.subr.bf16.mxu0 %v3588_v26 }
 0x3c4   : > { %2439 = vmatprep.subr.bf16.mxu1 %v3591_v27 }
 0x3c6   : > { %2399 = vmatpush1.bf16.msra.mxu0 %v3586_v22 }
 0x3c7   : > { %2440 = vmatpush1.bf16.msra.mxu1 %v3589_v29  ;;  %2626 = vmatprep.subr.bf16.mxu0 %v3594_v32  ;;  %v2133_v29 = vld [vmem:[#allocation5] sm:$0xff] }
 0x3c8   : > { %2667 = vmatprep.subr.bf16.mxu1 %v3597_v33 }
 0x3c9   : > { %2417 = vmatmul.mubr.bf16.vlgmr.msra.gmra.mrb[4].mxu0 %v2191_v31 }
 0x3ca   : > { %2658 = vmatprep.mubr.bf16.mxu0 %v4036_v28  ;;  %2458 = vmatmul.mubr.bf16.vlgmr.msra.gmra.mrb[4].mxu1 %v2191_v31 }
 0x3cb   : > { %2627 = vmatpush1.bf16.msra.mxu0 %v3592_v34  ;;  %2668 = vmatpush1.bf16.msra.mxu1 %v3595_v35 }
 0x3cc   : > { %2699 = vmatprep.mubr.bf16.mxu1 %v4036_v28  ;;  %2628 = vmatprep.subr.bf16.mxu0 %v3600_v36 }
 0x3cd   : > { %2669 = vmatprep.subr.bf16.mxu1 %v3603_v37 }
 0x3cf   : > { %2629 = vmatpush1.bf16.msra.mxu0 %v3598_v38  ;;  %2670 = vmatpush1.bf16.msra.mxu1 %v3601_v39 }
 0x3d0   : > { %2630 = vmatprep.subr.bf16.mxu0 %v3606_v40  ;;  %2671 = vmatprep.subr.bf16.mxu1 %v3609_v41 }
 0x3d3   : > { %2631 = vmatpush1.bf16.msra.mxu0 %v3604_v42  ;;  %2672 = vmatpush1.bf16.msra.mxu1 %v3607_v43 }
 0x3d4   : > { %2632 = vmatprep.subr.bf16.mxu0 %v3612_v59  ;;  %2673 = vmatprep.subr.bf16.mxu1 %v3615_v44 }
 0x3d7   : > { %2633 = vmatpush1.bf16.msra.mxu0 %v3610_v60  ;;  %2674 = vmatpush1.bf16.msra.mxu1 %v3613_v45 }
 0x3d8   : > { %2634 = vmatprep.subr.bf16.mxu0 %v3618_v46  ;;  %2675 = vmatprep.subr.bf16.mxu1 %v3621_v63  ;;  %v3642_v46 = vld [vmem:[#allocation22 + $0x4] ss:$8 sps:$4 sm:$0xff]   ;;  %v3640_v63 = vld [vmem:[#allocation22] ss:$8 sps:$4 sm:$0xff]  }
 0x3db   : > { %2635 = vmatpush1.bf16.msra.mxu0 %v3616_v0  ;;  %2676 = vmatpush1.bf16.msra.mxu1 %v3619_v47  ;;  %v3645_v0 = vld [vmem:[#allocation22 + $0x14] ss:$8 sps:$4 sm:$0xff]   ;;  %v3643_v47 = vld [vmem:[#allocation22 + $0x10] ss:$8 sps:$4 sm:$0xff]  }
 0x3dc   : > { %2636 = vmatprep.subr.bf16.mxu0 %v3624_v54  ;;  %2677 = vmatprep.subr.bf16.mxu1 %v3627_v50  ;;  %v3646_v54 = vld [vmem:[#allocation22 + $0x20] ss:$8 sps:$4 sm:$0xff]   ;;  %v3654_v50 = vld [vmem:[#allocation22 + $0x44] ss:$8 sps:$4 sm:$0xff]  }
 0x3df   : > { %2637 = vmatpush1.bf16.msra.mxu0 %v3622_v48  ;;  %2678 = vmatpush1.bf16.msra.mxu1 %v3625_v49  ;;  %v3648_v48 = vld [vmem:[#allocation22 + $0x24] ss:$8 sps:$4 sm:$0xff]   ;;  %v3649_v49 = vld [vmem:[#allocation22 + $0x30] ss:$8 sps:$4 sm:$0xff]  }
 0x3e0   : > { %2638 = vmatprep.subr.bf16.mxu0 %v3630_v55  ;;  %2679 = vmatprep.subr.bf16.mxu1 %v3633_v51  ;;  %v3652_v55 = vld [vmem:[#allocation22 + $0x40] ss:$8 sps:$4 sm:$0xff]   ;;  %v3657_v51 = vld [vmem:[#allocation22 + $0x54] ss:$8 sps:$4 sm:$0xff]  }
 0x3e3   : > { %2639 = vmatpush1.bf16.msra.mxu0 %v3628_v52  ;;  %2680 = vmatpush1.bf16.msra.mxu1 %v3631_v57  ;;  %v3655_v52 = vld [vmem:[#allocation22 + $0x50] ss:$8 sps:$4 sm:$0xff]   ;;  %v3660_v57 = vld [vmem:[#allocation22 + $0x64] ss:$8 sps:$4 sm:$0xff]  }
 0x3e4   : > { %2640 = vmatprep.subr.bf16.mxu0 %v3636_v56  ;;  %2681 = vmatprep.subr.bf16.mxu1 %v3639_v53  ;;  %v3658_v56 = vld [vmem:[#allocation22 + $0x60] ss:$8 sps:$4 sm:$0xff]   ;;  %v3663_v53 = vld [vmem:[#allocation22 + $0x74] ss:$8 sps:$4 sm:$0xff]  }
 0x3e7   : > { %2641 = vmatpush1.bf16.msra.mxu0 %v3634_v58  ;;  %2682 = vmatpush1.bf16.msra.mxu1 %v3637_v61  ;;  %v3661_v58 = vld [vmem:[#allocation22 + $0x70] ss:$8 sps:$4 sm:$0xff]   ;;  %v2710_v61 = vlaneseq }
 0x3e8   : > { %2867 = vmatprep.subr.bf16.mxu0 %v3642_v46 }
 0x47c   : > { %v2081_v2 = vpop.f32.mrb[0].mxu0  ;;  %v2122_v12 = vpop.f32.mrb[0].mxu1 }
 0x47d   : > { %v2129_v3 = vadd.f32 %v2081_v2, %v1849_v62  ;;  %v2083_v4 = vpop.f32.mrb[1].mxu0  ;;  %v2124_v14 = vpop.f32.mrb[1].mxu1  ;;  %v2131_v21 = vadd.f32 %v2122_v12, %v1851_v19  ;;  %v4724_v62 = vshrl.u32 %v2710_v61, 7  ;;  %v2708_v2 = vld [vmem:[#allocation21] sm:$0xf] }
 0x47e   : > { %v2130_v5 = vadd.f32 %v2083_v4, %v1850_v1  ;;  %v2085_v6 = vpop.f32.mrb[2].mxu0  ;;  %v2132_v15 = vadd.f32 %v2124_v14, %v1852_v10  ;;  %v2126_v16 = vpop.f32.mrb[2].mxu1 }
 0x47f   : > { %v2134_v7 = vsub.f32 0.0, %v2129_v3  ;;  %v2086_v8 = vpop.f32.mrb[3].mxu0  ;;  %v2127_v17 = vpop.f32.mrb[3].mxu1  ;;  %v2712_v1 = vsub.s32 0, %v4724_v62  ;;  %v2716_v3 = vsub.s32 1, %v4724_v62 }
 0x480   : > { %v2135_v9 = vsub.f32 0.0, %v2130_v5  ;;  %v2145_v18 = vsub.f32 0.0, %v2132_v15  ;;  %v2724_v8 = vsub.s32 3, %v4724_v62 }
 0x481   : > { %v2136_v11 = vmul.f32 1.442695, %v2134_v7  ;;  %v2713_v4 = vrot.slane %v2708_v2, %v2712_v1  ;;  %v2717_v7 = vrot.slane %v2708_v2, %v2716_v3 }
 0x482   : > { %v2138_v13 = vmul.f32 1.442695, %v2135_v9  ;;  %v2146_v20 = vmul.f32 1.442695, %v2145_v18 }
 0x483   : > { %3664 = vpow2.f32 %v2136_v11 }
 0x484   : > { %3666 = vpow2.f32 %v2138_v13 }
 0x485   : > { %3668 = vpow2.f32 %v2146_v20 }
 0x486   : > { %3670 = vtanh.f32 %v2131_v21  ;;  %v2725_v21 = vrot.slane %v2708_v2, %v2724_v8 }
 0x48d   : > { %v3665_v23 = vpop.eup %3664 }
 0x48e   : > { %v3667_v24 = vpop.eup %3666  ;;  %v2140_v25 = vadd.f32 1.0, %v3665_v23 }
 0x48f   : > { %v2141_v26 = vadd.f32 1.0, %v3667_v24  ;;  %v3669_v22 = vpop.eup %3668 }
 0x490   : > { %3672 = vrcp.f32 %v2140_v25  ;;  %v3671_v27 = vpop.eup %3670  ;;  %v2148_v31 = vadd.f32 1.0, %v3669_v22 }
 0x491   : > { %3674 = vrcp.f32 %v2141_v26 }
 0x492   : > { %3676 = vrcp.f32 %v2148_v31 }
 0x49a   : > { %v3673_v30 = vpop.eup %3672 }
 0x49b   : > { %v3675_v32 = vpop.eup %3674  ;;  %v2151_v33 = vmul.f32 %v3673_v30, %v3671_v27  ;;  %v2720_v27 = vsub.s32 2, %v4724_v62 }
 0x49c   : > { %v2150_v34 = vmul.f32 %v3675_v32, %v2133_v29  ;;  %v3677_v36 = vpop.eup %3676  ;;  %v2418_v40 = vpop.f32.mrb[4].mxu0 }
 0x49d   : > { %v2420_v41 = vpop.f32.mrb[5].mxu0  ;;  %v2459_v59 = vpop.f32.mrb[4].mxu1  ;;  %v2721_v30 = vrot.slane %v2708_v2, %v2720_v27 }
 0x49e   : > { %v2152_v35 = vadd.f32 %v2151_v33, %v2150_v34  ;;  %v2422_v42 = vpop.f32.mrb[6].mxu0  ;;  %v2461_v44 = vpop.f32.mrb[5].mxu1 }
 0x49f   : > { %v2423_v43 = vpop.f32.mrb[7].mxu0  ;;  %v2463_v60 = vpop.f32.mrb[6].mxu1 }
 0x4a0   : > { %3678 = vtanh.f32 %v2152_v35  ;;  %2156 = vst [vmem:[#allocation5] sm:$0xff] %v2152_v35  ;;  %v2464_v45 = vpop.f32.mrb[7].mxu1 }
 0x4aa   : > { %v3679_v37 = vpop.eup %3678 }
 0x4ab   : > { %v2154_v38 = vmul.f32 %v3679_v37, %v3677_v36 }
 0x4ad   : > { %2155 = vst [vmem:[#allocation4] sm:$0xff] %v2154_v38  ;;  %v2157_v39 = vpack.c.bf16 %v2154_v38, %v2154_v38 }
 0x4af   : > { %2659 = vmatmul.mubr.bf16.vlgmr.msra.gmra.mrb[8].mxu0 %v2157_v39  ;;  %2700 = vmatmul.mubr.bf16.vlgmr.msra.gmra.mrb[8].mxu1 %v2157_v39  ;;  %v2734_v39 = vld [vmem:[#allocation7] sm:$0xff] }
 0x4b0   : > { %2899 = vmatprep.mubr.bf16.mxu0 %v4036_v28  ;;  %2868 = vmatpush1.bf16.msra.mxu0 %v3640_v63  ;;  %v3651_v28 = vld [vmem:[#allocation22 + $0x34] ss:$8 sps:$4 sm:$0xff]  }
 0x4b1   : > { %2869 = vmatprep.subr.bf16.mxu0 %v3645_v0  ;;  %v2775_v0 = vld [vmem:[%s4794_s10] sm:$0x3] }
 0x4b4   : > { %2870 = vmatpush1.bf16.msra.mxu0 %v3643_v47  ;;  %v2780_v47 = vrot.slane %v2775_v0, %v2712_v1 }
 0x4b5   : > { %2871 = vmatprep.subr.bf16.mxu0 %v3648_v48  ;;  %v2784_v48 = vrot.slane %v2775_v0, %v2716_v3 }
 0x4b8   : > { %2872 = vmatpush1.bf16.msra.mxu0 %v3646_v54 }
 0x4b9   : > { %2873 = vmatprep.subr.bf16.mxu0 %v3651_v28 }
 0x4bc   : > { %2874 = vmatpush1.bf16.msra.mxu0 %v3649_v49 }
 0x4bd   : > { %2875 = vmatprep.subr.bf16.mxu0 %v3654_v50 }
 0x4c0   : > { %2876 = vmatpush1.bf16.msra.mxu0 %v3652_v55 }
 0x4c1   : > { %2877 = vmatprep.subr.bf16.mxu0 %v3657_v51 }
 0x4c4   : > { %2878 = vmatpush1.bf16.msra.mxu0 %v3655_v52 }
 0x4c5   : > { %2879 = vmatprep.subr.bf16.mxu0 %v3660_v57 }
 0x4c8   : > { %2880 = vmatpush1.bf16.msra.mxu0 %v3658_v56 }
 0x4c9   : > { %2881 = vmatprep.subr.bf16.mxu0 %v3663_v53 }
 0x4cc   : > { %2882 = vmatpush1.bf16.msra.mxu0 %v3661_v58 }
 0x582   : > { %v2660_v5 = vpop.f32.mrb[8].mxu0  ;;  %v2701_v6 = vpop.f32.mrb[8].mxu1 }
 0x583   : > { %v2661_v9 = vadd.f32 %v2660_v5, %v2418_v40  ;;  %v2702_v10 = vadd.f32 %v2701_v6, %v2459_v59  ;;  %v2662_v11 = vpop.f32.mrb[9].mxu0  ;;  %v2703_v12 = vpop.f32.mrb[9].mxu1 }
 0x584   : > { %v2663_v13 = vadd.f32 %v2662_v11, %v2420_v41  ;;  %v2704_v14 = vadd.f32 %v2703_v12, %v2461_v44  ;;  %v2664_v15 = vpop.f32.mrb[10].mxu0  ;;  %v2705_v16 = vpop.f32.mrb[10].mxu1 }
 0x585   : > { %v2730_v17 = vadd.f32 %v2713_v4, %v2661_v9  ;;  %v2665_v18 = vpop.f32.mrb[11].mxu0  ;;  %v2706_v19 = vpop.f32.mrb[11].mxu1  ;;  %v2732_v32 = vadd.f32 %v2721_v30, %v2702_v10 }
 0x586   : > { %v2731_v20 = vadd.f32 %v2717_v7, %v2663_v13  ;;  %v2733_v22 = vadd.f32 %v2725_v21, %v2704_v14 }
 0x587   : > { %v2735_v23 = vsub.f32 0.0, %v2730_v17 }
 0x588   : > { %v2736_v24 = vsub.f32 0.0, %v2731_v20  ;;  %v2746_v29 = vsub.f32 0.0, %v2733_v22 }
 0x589   : > { %v2737_v25 = vmul.f32 1.442695, %v2735_v23 }
 0x58a   : > { %v2739_v26 = vmul.f32 1.442695, %v2736_v24  ;;  %v2747_v31 = vmul.f32 1.442695, %v2746_v29 }
 0x58b   : > { %3680 = vpow2.f32 %v2737_v25 }
 0x58c   : > { %3682 = vpow2.f32 %v2739_v26 }
 0x58d   : > { %3684 = vpow2.f32 %v2747_v31 }
 0x58e   : > { %3686 = vtanh.f32 %v2732_v32 }
 0x595   : > { %v3681_v33 = vpop.eup %3680 }
 0x596   : > { %v3683_v34 = vpop.eup %3682  ;;  %v2741_v35 = vadd.f32 1.0, %v3681_v33 }
 0x597   : > { %v2742_v36 = vadd.f32 1.0, %v3683_v34  ;;  %v3685_v37 = vpop.eup %3684 }
 0x598   : > { %3688 = vrcp.f32 %v2741_v35  ;;  %v3687_v38 = vpop.eup %3686  ;;  %v2749_v43 = vadd.f32 1.0, %v3685_v37 }
 0x599   : > { %3690 = vrcp.f32 %v2742_v36 }
 0x59a   : > { %3692 = vrcp.f32 %v2749_v43 }
 0x5a2   : > { %v3689_v40 = vpop.eup %3688 }
 0x5a3   : > { %v3691_v41 = vpop.eup %3690  ;;  %v2752_v42 = vmul.f32 %v3689_v40, %v3687_v38 }
 0x5a4   : > { %v2751_v59 = vmul.f32 %v3691_v41, %v2734_v39  ;;  %v3693_v60 = vpop.eup %3692 }
 0x5a6   : > { %v2753_v44 = vadd.f32 %v2752_v42, %v2751_v59 }
 0x5a8   : > { %2757 = vst [vmem:[#allocation7] sm:$0xff] %v2753_v44  ;;  %3694 = vtanh.f32 %v2753_v44 }
 0x5b2   : > { %v3695_v45 = vpop.eup %3694 }
 0x5b3   : > { %v2755_v46 = vmul.f32 %v3695_v45, %v3693_v60 }
 0x5b5   : > { %2756 = vst [vmem:[#allocation6] sm:$0xff] %v2755_v46  ;;  %v2758_v63 = vpack.c.bf16 %v2755_v46, %v2755_v46 }
 0x5b7   : > { %2900 = vmatmul.mubr.bf16.vlgmr.msra.gmra.mrb[12].mxu0 %v2758_v63 }
 0x68a   : > { %v2901_v54 = vpop.f32.mrb[12].mxu0 }
 0x68b   : > { %v2902_v28 = vadd.f32 %v2901_v54, %v2780_v47  ;;  %v2903_v49 = vpop.f32.mrb[13].mxu0 }
 0x68c   : > { %v2904_v50 = vadd.f32 %v2903_v49, %v2784_v48  ;;  %v2905_v55 = vpop.f32.mrb[14].mxu0 }
 0x68d   : > { %2908 = vst [vmem:[%s4381_s17] sm:$0xff] %v2902_v28  ;;  %v2906_v51 = vpop.f32.mrb[15].mxu0 }
 0x68e   : > { %2909 = vst [vmem:[%s4381_s17 + $0x8] sm:$0xff] %v2904_v50 }
 0x68f   : > { %3945 = shalt.err (!%p3942_p4)
}
 0x690   : > { %s3946_s23 = scalar_lea.hbm %s4738_s18, 256  ;;  %s3950_s14 = scalar_lea.hbm %s4795_s11, 2560 }
 0x691   : > { %p3947_p12 = scmp.ne.s32.totalorder %s4738_s18, %s3946_s23  ;;  %p3951_p5 = scmp.lt.u32.totalorder %s4738_s18, %s4795_s11 }
 0x692   : > { %p3952_p7 = scmp.lt.u32.totalorder %s3950_s14, %s3946_s23  ;;  %p3954_p0 = scmp.lt.u32.totalorder %s3946_s23, %s4738_s18 }
 0x693   : > { %p3948_p13 = pnand %p3947_p12, %p4834_p10 }
 0x694   : > { %p3953_p11 = por %p3952_p7, %p3951_p5 }
 0x695   : > { %p3949_p3 = pneg %p3948_p13 }
 0x696   : > { %p3955_p6 = por %p3954_p0, %p3953_p11 }
 0x698   : > { %p3956_p2 = pnand %p3955_p6, %p3949_p3 }
 0x69a   : > { %3959 = shalt.err (!%p3956_p2)
}
 0x69b   : > { %3333 = dma.vmem_to_hbm [thread:$0]  (%p4834_p10), %s4740_s30, 256, %s4738_s18, %s2911_s25  }
 0x69c PF: > { %s4835_s21 = sld [smem:[#allocation34_spill]]  ;;  %s4836_s27 = sld [smem:[#allocation32_spill]] }
 0x69d   : > { %s4837_s28 = sld [smem:[#allocation37_spill]] }
 0x6a2   : > { %p3380_p1 = scmp.ge.s32.totalorder %s4835_s21, 2  ;;  %s2937_s13 = sand.u32 1, %s4836_s27  }
 0x6a3   : > { %p4838_p8 = scmp.ne.s32.totalorder %s4837_s28, 0  ;;  %s2938_s16 = scalar_lea.sflag [#allocation12], %s2937_s13 }
 0x6a5   : > { %p3361_p9 = pnand %p3380_p1, %p4838_p8 }
 0x6a7   : > { %3999 = dma.done.wait (!%p3361_p9), %s2938_s16, 256  }
 0x6a8   : > { %4001 = vsyncadd (!%p3361_p9), %s2938_s16, 4294967040  ;;  %s4839_s24 = sld [smem:[#allocation35_spill]]  ;;  %s4840_s15 = sld [smem:[#allocation33_spill]] }
 0x6a9   : > { %s4841_s23 = sld [smem:[#allocation36_spill]]  ;;  %s4842_s0 = smov %s4008_s22 }
 0x6ae   : > { %p32_p4 = scmp.ge.s32.totalorder %s4839_s24, 12   ;;  %s4843_s22 = smov %s4840_s15 }
 0x6b0   :  { %34 = sbr.rel (!%p32_p4) target bundleno = 23 (0x17), region = 133 }
 0x6b7   :  { %2943 = vsyncpa [#allocation11], 1 }
 0x6b8   :  { %2945 = vsyncpa [#allocation11 + $0x1], 1 }
 0x6b9   :  { %2946 = vsyncpa [#allocation14], 1 }
 0x6ba   :  { %2947 = vsyncpa [#allocation17], 1 }
 0x6bb   :  { %2948 = vsyncpa [#allocation20], 1 }
 0x6bc   :  { %2949 = vsyncpa [#allocation23], 1 }
 0x6bd   :  { %2950 = vsyncpa [#allocation12], 1 }
 0x6be   :  { %2952 = vsyncpa [#allocation12 + $0x1], 1 }

</bundles_post_ra>
